<compile_context>
chip_gen: v6e
topology: v6e:2x2x1
jax: 0.10.0
libtpu: 0.0.40
codegen_flags: <defaults>
</compile_context>

<pallas_src>
import functools

import jax
import jax.numpy as jnp
from jax import lax
from jax.experimental import pallas as pl
from jax.experimental.pallas import tpu as pltpu


def _round_up(x, m):
    return (x + m - 1) // m * m


def _atten_pred_kernel(ev_ref, imgs_ref, mask_ref, avg_ref, sel_ref,
                       w0_ref, b0_ref, sew_ref, seb_ref, wl_ref, bl_ref,
                       out_ref, *, W, L):
    # ev_ref   : (CIP, L)        event input, channel-major, L = n_img*H*W, channels padded to 8
    # imgs_ref : (CMP, L)        image features, channel-major, padded to 8
    # mask_ref : (9, 1, L)       1.0 where tap (dy,dx) is in-bounds for its image, else 0.0
    # avg_ref  : (L, n_img)      block-diagonal per-image averaging matrix (1/HW entries)
    # sel_ref  : (n_img, L)      block-diagonal per-image broadcast (ones) matrix
    # w0_ref   : (CMP, 9*CIP)    fused conv0 weights (bf16), column = (ky*3+kx)*CIP + cin
    # b0_ref   : (CMP, 1)
    # sew_ref  : (CMP, CIP)      SE 1x1 conv weight (f32, tiny)
    # seb_ref  : (CMP, 1)
    # wl_ref   : (CLP, 9*CMP)    fused conv_last weights (bf16), output rows padded to 8
    # bl_ref   : (CLP, 1)
    # out_ref  : (CLP, L)        lane-dense, full-sublane output slab

    def im2col(a):
        # 9 shifted-and-masked copies of a (C, L) map -> (9*C, L) in bf16.  dx/dy shifts
        # are lane rolls (XLU, otherwise idle); halo / cross-image positions are zeroed
        # by the shared mask.  Every f32 piece is 8 rows -> tile-aligned concat; the
        # single bf16 cast halves the operand vreg/VMEM footprint feeding the MXU.
        pieces = []
        for k in range(9):
            dy, dx = k // 3 - 1, k % 3 - 1
            if dy == 0 and dx == 0:
                pieces.append(a)
                continue
            shift = (-(dy * W + dx)) % L
            pieces.append(pltpu.roll(a, shift, 1) * mask_ref[k])
        return jnp.concatenate(pieces, axis=0).astype(jnp.bfloat16)

    ev = ev_ref[...]

    # ---- conv0: 3x3 SAME conv + bias + LeakyReLU(0.2) as one (CMP,9CIP)x(9CIP,L) matmul.
    y0 = jnp.dot(w0_ref[...], im2col(ev), preferred_element_type=jnp.float32)
    y0 = y0 + b0_ref[...]
    y0 = jnp.where(y0 >= 0, y0, 0.2 * y0)

    # ---- SE gate: pool first (per image), then the tiny 1x1 conv, then sigmoid,
    # then broadcast back onto the lane axis via the selector matmul (K = n_img).
    pooled = jnp.dot(ev, avg_ref[...], preferred_element_type=jnp.float32)          # (CIP, n_img)
    gate = jax.nn.sigmoid(
        jnp.dot(sew_ref[...], pooled, preferred_element_type=jnp.float32)
        + seb_ref[...])                                                              # (CMP, n_img)
    gate_full = jnp.dot(gate, sel_ref[...], preferred_element_type=jnp.float32)      # (CMP, L)

    # ---- x = gate * (conv0(ev) + imgs): a few vregs of f32 VPU work.
    x = gate_full * (y0 + imgs_ref[...])

    # ---- conv_last: 3x3 SAME conv + bias as one (CLP,9CMP)x(9CMP,L) matmul.
    out = jnp.dot(wl_ref[...], im2col(x), preferred_element_type=jnp.float32) + bl_ref[...]
    out_ref[...] = out.astype(out_ref.dtype)


def _prepare(params, H, W, n_img):
    """One-time preprocessing of weights / masks (depends only on params and H, W, n_img)."""
    Cmid, Cin = params["w0"].shape[0], params["w0"].shape[1]
    Clast = params["wl"].shape[0]
    CIP, CMP, CLP = _round_up(Cin, 8), _round_up(Cmid, 8), _round_up(Clast, 8)
    HW = H * W
    L = n_img * HW

    # Fused 3x3 conv weights: (Cout_pad, 9*Cin_pad), column = (ky*3+kx)*Cin_pad + cin; bf16.
    w0_mat = jnp.pad(jnp.transpose(params["w0"], (0, 2, 3, 1)),
                     ((0, CMP - Cmid), (0, 0), (0, 0), (0, CIP - Cin))
                     ).reshape(CMP, 9 * CIP).astype(jnp.bfloat16)
    wl_mat = jnp.pad(jnp.transpose(params["wl"], (0, 2, 3, 1)),
                     ((0, CLP - Clast), (0, 0), (0, 0), (0, CMP - Cmid))
                     ).reshape(CLP, 9 * CMP).astype(jnp.bfloat16)
    b0_col = jnp.pad(params["b0"], (0, CMP - Cmid)).reshape(CMP, 1)
    bl_col = jnp.pad(params["bl"], (0, CLP - Clast)).reshape(CLP, 1)
    sew_cm = jnp.pad(params["sew"], ((0, CMP - Cmid), (0, CIP - Cin)))
    seb_col = jnp.pad(params["seb"], (0, CMP - Cmid)).reshape(CMP, 1)

    # Border masks for the 9 taps of a 3x3 SAME conv, tiled over the images in one block.
    yy, xx = jnp.meshgrid(jnp.arange(H), jnp.arange(W), indexing="ij")
    yy, xx = yy.reshape(1, HW), xx.reshape(1, HW)
    masks = []
    for k in range(9):
        dy, dx = k // 3 - 1, k % 3 - 1
        valid = (yy + dy >= 0) & (yy + dy < H) & (xx + dx >= 0) & (xx + dx < W)
        masks.append(valid.astype(jnp.float32))
    taps_mask = jnp.tile(jnp.stack(masks, axis=0), (1, 1, n_img))        # (9, 1, L)

    # Block-diagonal per-image averaging / broadcast matrices for the SE branch.
    img_id = jnp.repeat(jnp.arange(n_img), HW)                           # (L,)
    onehot = (img_id[:, None] == jnp.arange(n_img)[None, :]).astype(jnp.float32)  # (L, n_img)
    avg_mat = onehot / HW
    sel_mat = onehot.T                                                   # (n_img, L)

    return dict(w0=w0_mat, b0=b0_col, sew=sew_cm, seb=seb_col, wl=wl_mat, bl=bl_col,
                mask=taps_mask, avg=avg_mat, sel=sel_mat)


def make_atten_pred(params, N, H, W):
    """Build an AttenPred forward for fixed params / shapes.  NCHW, float32 in/out."""
    Cmid, Cin = params["w0"].shape[0], params["w0"].shape[1]
    Clast = params["wl"].shape[0]
    CIP, CMP, CLP = _round_up(Cin, 8), _round_up(Cmid, 8), _round_up(Clast, 8)
    HW = H * W

    # >=2 parallel grid steps when the batch allows it (feeds v7x's second TensorCore);
    # otherwise fold the whole batch into one fat lane slab (fewer, fatter steps win at
    # tiny N since per-step overhead and MXU weight pushes dominate).
    n_blocks = 2 if (N >= 4 and N % 2 == 0) else 1
    n_img = N // n_blocks
    L = n_img * HW

    prep = _prepare(params, H, W, n_img)
    kernel = functools.partial(_atten_pred_kernel, W=W, L=L)

    grid_spec = pltpu.PrefetchScalarGridSpec(
        num_scalar_prefetch=0,
        grid=(n_blocks,),
        in_specs=[
            pl.BlockSpec((CIP, L),         lambda b: (0, b)),      # ev (channel-major)
            pl.BlockSpec((CMP, L),         lambda b: (0, b)),      # imgs (channel-major)
            pl.BlockSpec((9, 1, L),        lambda b: (0, 0, 0)),   # border masks
            pl.BlockSpec((L, n_img),       lambda b: (0, 0)),      # per-image averaging
            pl.BlockSpec((n_img, L),       lambda b: (0, 0)),      # per-image broadcast
            pl.BlockSpec((CMP, 9 * CIP),   lambda b: (0, 0)),      # conv0 weight (fused, bf16)
            pl.BlockSpec((CMP, 1),         lambda b: (0, 0)),      # conv0 bias
            pl.BlockSpec((CMP, CIP),       lambda b: (0, 0)),      # SE weight
            pl.BlockSpec((CMP, 1),         lambda b: (0, 0)),      # SE bias
            pl.BlockSpec((CLP, 9 * CMP),   lambda b: (0, 0)),      # conv_last weight (fused, bf16)
            pl.BlockSpec((CLP, 1),         lambda b: (0, 0)),      # conv_last bias
        ],
        out_specs=pl.BlockSpec((CLP, L), lambda b: (0, b)),
    )
    # TODO(synk): for large H*W, add a spatial row-tile grid axis (tile height derived from
    # v7x's 64 MiB VMEM -- the two im2col temporaries grow 9x faster than the activations)
    # with a 1-row halo and a separate pre-pass for the global SE mean; whole-image blocks
    # are fine for the small feature maps this module targets.
    call = pl.pallas_call(
        kernel,
        out_shape=jax.ShapeDtypeStruct((CLP, N * HW), jnp.float32),
        grid_spec=grid_spec,
        compiler_params=pltpu.CompilerParams(dimension_semantics=("parallel",)),
    )

    @jax.jit
    def forward(ev, imgs):
        # Channel-major, lane-dense activations with the batch folded onto the lane axis.
        ev_cm = jnp.pad(jnp.transpose(ev, (1, 0, 2, 3)).reshape(Cin, N * HW),
                        ((0, CIP - Cin), (0, 0)))
        imgs_cm = jnp.pad(jnp.transpose(imgs, (1, 0, 2, 3)).reshape(Cmid, N * HW),
                          ((0, CMP - Cmid), (0, 0)))
        out_cm = call(ev_cm, imgs_cm, prep["mask"], prep["avg"], prep["sel"],
                      prep["w0"], prep["b0"], prep["sew"], prep["seb"],
                      prep["wl"], prep["bl"])
        # (CLP, N*HW) -> (N, Clast, H, W)
        return out_cm[:Clast].reshape(Clast, N, H, W).transpose(1, 0, 2, 3)

    return forward


def init_params(key, cin, cmid, clast):
    ks = jax.random.split(key, 6)
    return dict(
        w0=0.1 * jax.random.normal(ks[0], (cmid, cin, 3, 3), jnp.float32),    # OIHW
        b0=0.1 * jax.random.normal(ks[1], (cmid,), jnp.float32),
        sew=0.1 * jax.random.normal(ks[2], (cmid, cin), jnp.float32),         # 1x1 conv
        seb=0.1 * jax.random.normal(ks[3], (cmid,), jnp.float32),
        wl=0.1 * jax.random.normal(ks[4], (clast, cmid, 3, 3), jnp.float32),  # OIHW
        bl=0.1 * jax.random.normal(ks[5], (clast,), jnp.float32),
    )


def ref_forward(ev, imgs, params):
    """Pure-JAX reference, mirrors the PyTorch forward (NCHW, f32)."""
    dn = lax.conv_dimension_numbers(ev.shape, params["w0"].shape, ('NCHW', 'OIHW', 'NCHW'))
    y = lax.conv_general_dilated(ev, params["w0"], (1, 1), 'SAME', dimension_numbers=dn)
    y = y + params["b0"][None, :, None, None]
    y = jnp.where(y >= 0, y, 0.2 * y)                              # LeakyReLU(0.2)
    x = y + imgs
    pooled = jnp.mean(ev, axis=(2, 3))                             # (N, Cin)
    gate = jax.nn.sigmoid(pooled @ params["sew"].T + params["seb"])
    x = x * gate[:, :, None, None]
    dn2 = lax.conv_dimension_numbers(x.shape, params["wl"].shape, ('NCHW', 'OIHW', 'NCHW'))
    out = lax.conv_general_dilated(x, params["wl"], (1, 1), 'SAME', dimension_numbers=dn2)
    return out + params["bl"][None, :, None, None]


if __name__ == "__main__":
    N, Cin, Cmid, Clast, H, W = 2, 4, 6, 3, 16, 16
    key = jax.random.PRNGKey(0)
    k_ev, k_img, k_p = jax.random.split(key, 3)
    ev = jax.random.normal(k_ev, (N, Cin, H, W), jnp.float32)      # PyTorch: (N, 4, 16, 16)
    imgs = jax.random.normal(k_img, (N, Cmid, H, W), jnp.float32)  # PyTorch: (N, 6, 16, 16)
    params = init_params(k_p, Cin, Cmid, Clast)

    forward = make_atten_pred(params, N, H, W)     # weight/mask prep hoisted, done once
    out = jax.block_until_ready(forward(ev, imgs))
    ref = jax.block_until_ready(ref_forward(ev, imgs, params))

    assert out.shape == (N, Clast, H, W)
    max_err = float(jnp.abs(out - ref).max())
    # bf16 matmul operands -> loosened tolerance vs. the f32 reference.
    assert jnp.allclose(out, ref, rtol=5e-2, atol=5e-2), max_err

    print("KERNEL_OK")
</pallas_src>

<mosaic_0001>
module attributes {stable_mosaic.version = 11 : i64} {
  func.func @_atten_pred_kernel(%arg0: i32, %arg1: memref<8x512xf32, #tpu.memory_space<vmem>>, %arg2: memref<8x512xf32, #tpu.memory_space<vmem>>, %arg3: memref<9x1x512xf32, #tpu.memory_space<vmem>>, %arg4: memref<512x2xf32, #tpu.memory_space<vmem>>, %arg5: memref<2x512xf32, #tpu.memory_space<vmem>>, %arg6: memref<8x72xbf16, #tpu.memory_space<vmem>>, %arg7: memref<8x1xf32, #tpu.memory_space<vmem>>, %arg8: memref<8x8xf32, #tpu.memory_space<vmem>>, %arg9: memref<8x1xf32, #tpu.memory_space<vmem>>, %arg10: memref<8x72xbf16, #tpu.memory_space<vmem>>, %arg11: memref<8x1xf32, #tpu.memory_space<vmem>>, %arg12: memref<8x512xf32, #tpu.memory_space<vmem>>) attributes {dimension_semantics = [#tpu.dimension_semantics<parallel>], iteration_bounds = array<i64: 1>, scalar_prefetch = 0 : i64, scratch_operands = 0 : i64, tpu.core_type = #tpu.core_type<tc>, window_params = [{transform_indices = @transform_0, window_bounds = array<i64: 8, 512>}, {transform_indices = @transform_1, window_bounds = array<i64: 8, 512>}, {pipeline_mode = #tpu.pipeline_mode<synchronous>, transform_indices = @transform_2, window_bounds = array<i64: 9, 1, 512>}, {pipeline_mode = #tpu.pipeline_mode<synchronous>, transform_indices = @transform_3, window_bounds = array<i64: 512, 2>}, {pipeline_mode = #tpu.pipeline_mode<synchronous>, transform_indices = @transform_4, window_bounds = array<i64: 2, 512>}, {pipeline_mode = #tpu.pipeline_mode<synchronous>, transform_indices = @transform_5, window_bounds = array<i64: 8, 72>}, {pipeline_mode = #tpu.pipeline_mode<synchronous>, transform_indices = @transform_6, window_bounds = array<i64: 8, 1>}, {pipeline_mode = #tpu.pipeline_mode<synchronous>, transform_indices = @transform_7, window_bounds = array<i64: 8, 8>}, {pipeline_mode = #tpu.pipeline_mode<synchronous>, transform_indices = @transform_8, window_bounds = array<i64: 8, 1>}, {pipeline_mode = #tpu.pipeline_mode<synchronous>, transform_indices = @transform_9, window_bounds = array<i64: 8, 72>}, {pipeline_mode = #tpu.pipeline_mode<synchronous>, transform_indices = @transform_10, window_bounds = array<i64: 8, 1>}, {transform_indices = @transform_11, window_bounds = array<i64: 8, 512>}]} {
    %c0 = arith.constant 0 : index
    %c0_0 = arith.constant 0 : index
    %0 = vector.load %arg1[%c0, %c0_0] : memref<8x512xf32, #tpu.memory_space<vmem>>, vector<8x512xf32>
    %c0_1 = arith.constant 0 : index
    %c0_2 = arith.constant 0 : index
    %1 = vector.load %arg6[%c0_1, %c0_2] : memref<8x72xbf16, #tpu.memory_space<vmem>>, vector<8x72xbf16>
    %c17_i32 = arith.constant 17 : i32
    %2 = tpu.dynamic_rotate %0 by %c17_i32 dim 1 : vector<8x512xf32>, i32 -> vector<8x512xf32>
    %c0_3 = arith.constant 0 : index
    %c0_4 = arith.constant 0 : index
    %c0_5 = arith.constant 0 : index
    %3 = vector.load %arg3[%c0_3, %c0_4, %c0_5] : memref<9x1x512xf32, #tpu.memory_space<vmem>>, vector<1x1x512xf32>
    %4 = vector.shape_cast %3 : vector<1x1x512xf32> to vector<1x512xf32>
    %5 = vector.broadcast %4 : vector<1x512xf32> to vector<8x512xf32>
    %6 = arith.mulf %2, %5 : vector<8x512xf32>
    %c16_i32 = arith.constant 16 : i32
    %7 = tpu.dynamic_rotate %0 by %c16_i32 dim 1 : vector<8x512xf32>, i32 -> vector<8x512xf32>
    %c1 = arith.constant 1 : index
    %c0_6 = arith.constant 0 : index
    %c0_7 = arith.constant 0 : index
    %8 = vector.load %arg3[%c1, %c0_6, %c0_7] : memref<9x1x512xf32, #tpu.memory_space<vmem>>, vector<1x1x512xf32>
    %9 = vector.shape_cast %8 : vector<1x1x512xf32> to vector<1x512xf32>
    %10 = vector.broadcast %9 : vector<1x512xf32> to vector<8x512xf32>
    %11 = arith.mulf %7, %10 : vector<8x512xf32>
    %c15_i32 = arith.constant 15 : i32
    %12 = tpu.dynamic_rotate %0 by %c15_i32 dim 1 : vector<8x512xf32>, i32 -> vector<8x512xf32>
    %c2 = arith.constant 2 : index
    %c0_8 = arith.constant 0 : index
    %c0_9 = arith.constant 0 : index
    %13 = vector.load %arg3[%c2, %c0_8, %c0_9] : memref<9x1x512xf32, #tpu.memory_space<vmem>>, vector<1x1x512xf32>
    %14 = vector.shape_cast %13 : vector<1x1x512xf32> to vector<1x512xf32>
    %15 = vector.broadcast %14 : vector<1x512xf32> to vector<8x512xf32>
    %16 = arith.mulf %12, %15 : vector<8x512xf32>
    %c1_i32 = arith.constant 1 : i32
    %17 = tpu.dynamic_rotate %0 by %c1_i32 dim 1 : vector<8x512xf32>, i32 -> vector<8x512xf32>
    %c3 = arith.constant 3 : index
    %c0_10 = arith.constant 0 : index
    %c0_11 = arith.constant 0 : index
    %18 = vector.load %arg3[%c3, %c0_10, %c0_11] : memref<9x1x512xf32, #tpu.memory_space<vmem>>, vector<1x1x512xf32>
    %19 = vector.shape_cast %18 : vector<1x1x512xf32> to vector<1x512xf32>
    %20 = vector.broadcast %19 : vector<1x512xf32> to vector<8x512xf32>
    %21 = arith.mulf %17, %20 : vector<8x512xf32>
    %c511_i32 = arith.constant 511 : i32
    %22 = tpu.dynamic_rotate %0 by %c511_i32 dim 1 : vector<8x512xf32>, i32 -> vector<8x512xf32>
    %c5 = arith.constant 5 : index
    %c0_12 = arith.constant 0 : index
    %c0_13 = arith.constant 0 : index
    %23 = vector.load %arg3[%c5, %c0_12, %c0_13] : memref<9x1x512xf32, #tpu.memory_space<vmem>>, vector<1x1x512xf32>
    %24 = vector.shape_cast %23 : vector<1x1x512xf32> to vector<1x512xf32>
    %25 = vector.broadcast %24 : vector<1x512xf32> to vector<8x512xf32>
    %26 = arith.mulf %22, %25 : vector<8x512xf32>
    %c497_i32 = arith.constant 497 : i32
    %27 = tpu.dynamic_rotate %0 by %c497_i32 dim 1 : vector<8x512xf32>, i32 -> vector<8x512xf32>
    %c6 = arith.constant 6 : index
    %c0_14 = arith.constant 0 : index
    %c0_15 = arith.constant 0 : index
    %28 = vector.load %arg3[%c6, %c0_14, %c0_15] : memref<9x1x512xf32, #tpu.memory_space<vmem>>, vector<1x1x512xf32>
    %29 = vector.shape_cast %28 : vector<1x1x512xf32> to vector<1x512xf32>
    %30 = vector.broadcast %29 : vector<1x512xf32> to vector<8x512xf32>
    %31 = arith.mulf %27, %30 : vector<8x512xf32>
    %c496_i32 = arith.constant 496 : i32
    %32 = tpu.dynamic_rotate %0 by %c496_i32 dim 1 : vector<8x512xf32>, i32 -> vector<8x512xf32>
    %c7 = arith.constant 7 : index
    %c0_16 = arith.constant 0 : index
    %c0_17 = arith.constant 0 : index
    %33 = vector.load %arg3[%c7, %c0_16, %c0_17] : memref<9x1x512xf32, #tpu.memory_space<vmem>>, vector<1x1x512xf32>
    %34 = vector.shape_cast %33 : vector<1x1x512xf32> to vector<1x512xf32>
    %35 = vector.broadcast %34 : vector<1x512xf32> to vector<8x512xf32>
    %36 = arith.mulf %32, %35 : vector<8x512xf32>
    %c495_i32 = arith.constant 495 : i32
    %37 = tpu.dynamic_rotate %0 by %c495_i32 dim 1 : vector<8x512xf32>, i32 -> vector<8x512xf32>
    %c8 = arith.constant 8 : index
    %c0_18 = arith.constant 0 : index
    %c0_19 = arith.constant 0 : index
    %38 = vector.load %arg3[%c8, %c0_18, %c0_19] : memref<9x1x512xf32, #tpu.memory_space<vmem>>, vector<1x1x512xf32>
    %39 = vector.shape_cast %38 : vector<1x1x512xf32> to vector<1x512xf32>
    %40 = vector.broadcast %39 : vector<1x512xf32> to vector<8x512xf32>
    %41 = arith.mulf %37, %40 : vector<8x512xf32>
    %42 = tpu.concatenate %6, %11, %16, %21, %0, %26, %31, %36, %41 in 0 : vector<8x512xf32>, vector<8x512xf32>, vector<8x512xf32>, vector<8x512xf32>, vector<8x512xf32>, vector<8x512xf32>, vector<8x512xf32>, vector<8x512xf32>, vector<8x512xf32> -> vector<72x512xf32>
    %43 = arith.truncf %42 : vector<72x512xf32> to vector<72x512xbf16>
    %cst = arith.constant dense<0.000000e+00> : vector<8x512xf32>
    %44 = tpu.matmul %1, %43, %cst {dimension_numbers = #tpu.dot_dimension_numbers<[1], [0], [0], [1], [0, 0, 1, 1], [], []>} : vector<8x72xbf16>, vector<72x512xbf16>, vector<8x512xf32> -> vector<8x512xf32>
    %c0_20 = arith.constant 0 : index
    %c0_21 = arith.constant 0 : index
    %45 = vector.load %arg7[%c0_20, %c0_21] : memref<8x1xf32, #tpu.memory_space<vmem>>, vector<8x1xf32>
    %46 = vector.broadcast %45 : vector<8x1xf32> to vector<8x512xf32>
    %47 = arith.addf %44, %46 : vector<8x512xf32>
    %cst_22 = arith.constant 0.000000e+00 : f32
    %48 = vector.broadcast %cst_22 : f32 to vector<8x512xf32>
    %49 = arith.cmpf oge, %47, %48 : vector<8x512xf32>
    %cst_23 = arith.constant 2.000000e-01 : f32
    %50 = vector.broadcast %cst_23 : f32 to vector<8x512xf32>
    %51 = arith.mulf %50, %47 : vector<8x512xf32>
    %52 = arith.select %49, %47, %51 : vector<8x512xi1>, vector<8x512xf32>
    %c0_24 = arith.constant 0 : index
    %c0_25 = arith.constant 0 : index
    %53 = vector.load %arg4[%c0_24, %c0_25] : memref<512x2xf32, #tpu.memory_space<vmem>>, vector<512x2xf32>
    %cst_26 = arith.constant dense<0.000000e+00> : vector<8x2xf32>
    %54 = tpu.matmul %0, %53, %cst_26 {dimension_numbers = #tpu.dot_dimension_numbers<[1], [0], [0], [1], [0, 0, 1, 1], [], []>} : vector<8x512xf32>, vector<512x2xf32>, vector<8x2xf32> -> vector<8x2xf32>
    %c0_27 = arith.constant 0 : index
    %c0_28 = arith.constant 0 : index
    %55 = vector.load %arg8[%c0_27, %c0_28] : memref<8x8xf32, #tpu.memory_space<vmem>>, vector<8x8xf32>
    %cst_29 = arith.constant dense<0.000000e+00> : vector<8x2xf32>
    %56 = tpu.matmul %55, %54, %cst_29 {dimension_numbers = #tpu.dot_dimension_numbers<[1], [0], [0], [1], [0, 0, 1, 1], [], []>} : vector<8x8xf32>, vector<8x2xf32>, vector<8x2xf32> -> vector<8x2xf32>
    %c0_30 = arith.constant 0 : index
    %c0_31 = arith.constant 0 : index
    %57 = vector.load %arg9[%c0_30, %c0_31] : memref<8x1xf32, #tpu.memory_space<vmem>>, vector<8x1xf32>
    %58 = vector.broadcast %57 : vector<8x1xf32> to vector<8x2xf32>
    %59 = arith.addf %56, %58 : vector<8x2xf32>
    %60 = arith.negf %59 : vector<8x2xf32>
    %61 = math.exp %60 : vector<8x2xf32>
    %cst_32 = arith.constant 1.000000e+00 : f32
    %62 = vector.broadcast %cst_32 : f32 to vector<8x2xf32>
    %63 = arith.addf %62, %61 : vector<8x2xf32>
    %64 = arith.divf %62, %63 : vector<8x2xf32>
    %c0_33 = arith.constant 0 : index
    %c0_34 = arith.constant 0 : index
    %65 = vector.load %arg5[%c0_33, %c0_34] : memref<2x512xf32, #tpu.memory_space<vmem>>, vector<2x512xf32>
    %cst_35 = arith.constant dense<0.000000e+00> : vector<8x512xf32>
    %66 = tpu.matmul %64, %65, %cst_35 {dimension_numbers = #tpu.dot_dimension_numbers<[1], [0], [0], [1], [0, 0, 1, 1], [], []>} : vector<8x2xf32>, vector<2x512xf32>, vector<8x512xf32> -> vector<8x512xf32>
    %c0_36 = arith.constant 0 : index
    %c0_37 = arith.constant 0 : index
    %67 = vector.load %arg2[%c0_36, %c0_37] : memref<8x512xf32, #tpu.memory_space<vmem>>, vector<8x512xf32>
    %68 = arith.addf %52, %67 : vector<8x512xf32>
    %69 = arith.mulf %66, %68 : vector<8x512xf32>
    %c0_38 = arith.constant 0 : index
    %c0_39 = arith.constant 0 : index
    %70 = vector.load %arg10[%c0_38, %c0_39] : memref<8x72xbf16, #tpu.memory_space<vmem>>, vector<8x72xbf16>
    %c17_i32_40 = arith.constant 17 : i32
    %71 = tpu.dynamic_rotate %69 by %c17_i32_40 dim 1 : vector<8x512xf32>, i32 -> vector<8x512xf32>
    %c0_41 = arith.constant 0 : index
    %c0_42 = arith.constant 0 : index
    %c0_43 = arith.constant 0 : index
    %72 = vector.load %arg3[%c0_41, %c0_42, %c0_43] : memref<9x1x512xf32, #tpu.memory_space<vmem>>, vector<1x1x512xf32>
    %73 = vector.shape_cast %72 : vector<1x1x512xf32> to vector<1x512xf32>
    %74 = vector.broadcast %73 : vector<1x512xf32> to vector<8x512xf32>
    %75 = arith.mulf %71, %74 : vector<8x512xf32>
    %c16_i32_44 = arith.constant 16 : i32
    %76 = tpu.dynamic_rotate %69 by %c16_i32_44 dim 1 : vector<8x512xf32>, i32 -> vector<8x512xf32>
    %c1_45 = arith.constant 1 : index
    %c0_46 = arith.constant 0 : index
    %c0_47 = arith.constant 0 : index
    %77 = vector.load %arg3[%c1_45, %c0_46, %c0_47] : memref<9x1x512xf32, #tpu.memory_space<vmem>>, vector<1x1x512xf32>
    %78 = vector.shape_cast %77 : vector<1x1x512xf32> to vector<1x512xf32>
    %79 = vector.broadcast %78 : vector<1x512xf32> to vector<8x512xf32>
    %80 = arith.mulf %76, %79 : vector<8x512xf32>
    %c15_i32_48 = arith.constant 15 : i32
    %81 = tpu.dynamic_rotate %69 by %c15_i32_48 dim 1 : vector<8x512xf32>, i32 -> vector<8x512xf32>
    %c2_49 = arith.constant 2 : index
    %c0_50 = arith.constant 0 : index
    %c0_51 = arith.constant 0 : index
    %82 = vector.load %arg3[%c2_49, %c0_50, %c0_51] : memref<9x1x512xf32, #tpu.memory_space<vmem>>, vector<1x1x512xf32>
    %83 = vector.shape_cast %82 : vector<1x1x512xf32> to vector<1x512xf32>
    %84 = vector.broadcast %83 : vector<1x512xf32> to vector<8x512xf32>
    %85 = arith.mulf %81, %84 : vector<8x512xf32>
    %c1_i32_52 = arith.constant 1 : i32
    %86 = tpu.dynamic_rotate %69 by %c1_i32_52 dim 1 : vector<8x512xf32>, i32 -> vector<8x512xf32>
    %c3_53 = arith.constant 3 : index
    %c0_54 = arith.constant 0 : index
    %c0_55 = arith.constant 0 : index
    %87 = vector.load %arg3[%c3_53, %c0_54, %c0_55] : memref<9x1x512xf32, #tpu.memory_space<vmem>>, vector<1x1x512xf32>
    %88 = vector.shape_cast %87 : vector<1x1x512xf32> to vector<1x512xf32>
    %89 = vector.broadcast %88 : vector<1x512xf32> to vector<8x512xf32>
    %90 = arith.mulf %86, %89 : vector<8x512xf32>
    %c511_i32_56 = arith.constant 511 : i32
    %91 = tpu.dynamic_rotate %69 by %c511_i32_56 dim 1 : vector<8x512xf32>, i32 -> vector<8x512xf32>
    %c5_57 = arith.constant 5 : index
    %c0_58 = arith.constant 0 : index
    %c0_59 = arith.constant 0 : index
    %92 = vector.load %arg3[%c5_57, %c0_58, %c0_59] : memref<9x1x512xf32, #tpu.memory_space<vmem>>, vector<1x1x512xf32>
    %93 = vector.shape_cast %92 : vector<1x1x512xf32> to vector<1x512xf32>
    %94 = vector.broadcast %93 : vector<1x512xf32> to vector<8x512xf32>
    %95 = arith.mulf %91, %94 : vector<8x512xf32>
    %c497_i32_60 = arith.constant 497 : i32
    %96 = tpu.dynamic_rotate %69 by %c497_i32_60 dim 1 : vector<8x512xf32>, i32 -> vector<8x512xf32>
    %c6_61 = arith.constant 6 : index
    %c0_62 = arith.constant 0 : index
    %c0_63 = arith.constant 0 : index
    %97 = vector.load %arg3[%c6_61, %c0_62, %c0_63] : memref<9x1x512xf32, #tpu.memory_space<vmem>>, vector<1x1x512xf32>
    %98 = vector.shape_cast %97 : vector<1x1x512xf32> to vector<1x512xf32>
    %99 = vector.broadcast %98 : vector<1x512xf32> to vector<8x512xf32>
    %100 = arith.mulf %96, %99 : vector<8x512xf32>
    %c496_i32_64 = arith.constant 496 : i32
    %101 = tpu.dynamic_rotate %69 by %c496_i32_64 dim 1 : vector<8x512xf32>, i32 -> vector<8x512xf32>
    %c7_65 = arith.constant 7 : index
    %c0_66 = arith.constant 0 : index
    %c0_67 = arith.constant 0 : index
    %102 = vector.load %arg3[%c7_65, %c0_66, %c0_67] : memref<9x1x512xf32, #tpu.memory_space<vmem>>, vector<1x1x512xf32>
    %103 = vector.shape_cast %102 : vector<1x1x512xf32> to vector<1x512xf32>
    %104 = vector.broadcast %103 : vector<1x512xf32> to vector<8x512xf32>
    %105 = arith.mulf %101, %104 : vector<8x512xf32>
    %c495_i32_68 = arith.constant 495 : i32
    %106 = tpu.dynamic_rotate %69 by %c495_i32_68 dim 1 : vector<8x512xf32>, i32 -> vector<8x512xf32>
    %c8_69 = arith.constant 8 : index
    %c0_70 = arith.constant 0 : index
    %c0_71 = arith.constant 0 : index
    %107 = vector.load %arg3[%c8_69, %c0_70, %c0_71] : memref<9x1x512xf32, #tpu.memory_space<vmem>>, vector<1x1x512xf32>
    %108 = vector.shape_cast %107 : vector<1x1x512xf32> to vector<1x512xf32>
    %109 = vector.broadcast %108 : vector<1x512xf32> to vector<8x512xf32>
    %110 = arith.mulf %106, %109 : vector<8x512xf32>
    %111 = tpu.concatenate %75, %80, %85, %90, %69, %95, %100, %105, %110 in 0 : vector<8x512xf32>, vector<8x512xf32>, vector<8x512xf32>, vector<8x512xf32>, vector<8x512xf32>, vector<8x512xf32>, vector<8x512xf32>, vector<8x512xf32>, vector<8x512xf32> -> vector<72x512xf32>
    %112 = arith.truncf %111 : vector<72x512xf32> to vector<72x512xbf16>
    %cst_72 = arith.constant dense<0.000000e+00> : vector<8x512xf32>
    %113 = tpu.matmul %70, %112, %cst_72 {dimension_numbers = #tpu.dot_dimension_numbers<[1], [0], [0], [1], [0, 0, 1, 1], [], []>} : vector<8x72xbf16>, vector<72x512xbf16>, vector<8x512xf32> -> vector<8x512xf32>
    %c0_73 = arith.constant 0 : index
    %c0_74 = arith.constant 0 : index
    %114 = vector.load %arg11[%c0_73, %c0_74] : memref<8x1xf32, #tpu.memory_space<vmem>>, vector<8x1xf32>
    %115 = vector.broadcast %114 : vector<8x1xf32> to vector<8x512xf32>
    %116 = arith.addf %113, %115 : vector<8x512xf32>
    %c0_75 = arith.constant 0 : index
    %c0_76 = arith.constant 0 : index
    %117 = vector.load %arg12[%c0_75, %c0_76] : memref<8x512xf32, #tpu.memory_space<vmem>>, vector<8x512xf32>
    tpu.vector_store %arg12[%c0_75, %c0_76], %116 {strides = array<i32>} : memref<8x512xf32, #tpu.memory_space<vmem>>, vector<8x512xf32>,
    return
  }
  func.func @transform_0(%arg0: i32) -> (i32, i32) {
    %c0_i32 = arith.constant 0 : i32
    %c0_i32_0 = arith.constant 0 : i32
    return %c0_i32, %arg0 : i32, i32
  }
  func.func @transform_1(%arg0: i32) -> (i32, i32) {
    %c0_i32 = arith.constant 0 : i32
    %c0_i32_0 = arith.constant 0 : i32
    return %c0_i32, %arg0 : i32, i32
  }
  func.func @transform_2(%arg0: i32) -> (i32, i32, i32) {
    %c0_i32 = arith.constant 0 : i32
    %c0_i32_0 = arith.constant 0 : i32
    %c0_i32_1 = arith.constant 0 : i32
    %c0_i32_2 = arith.constant 0 : i32
    return %c0_i32, %c0_i32_0, %c0_i32_1 : i32, i32, i32
  }
  func.func @transform_3(%arg0: i32) -> (i32, i32) {
    %c0_i32 = arith.constant 0 : i32
    %c0_i32_0 = arith.constant 0 : i32
    %c0_i32_1 = arith.constant 0 : i32
    return %c0_i32, %c0_i32_0 : i32, i32
  }
  func.func @transform_4(%arg0: i32) -> (i32, i32) {
    %c0_i32 = arith.constant 0 : i32
    %c0_i32_0 = arith.constant 0 : i32
    %c0_i32_1 = arith.constant 0 : i32
    return %c0_i32, %c0_i32_0 : i32, i32
  }
  func.func @transform_5(%arg0: i32) -> (i32, i32) {
    %c0_i32 = arith.constant 0 : i32
    %c0_i32_0 = arith.constant 0 : i32
    %c0_i32_1 = arith.constant 0 : i32
    return %c0_i32, %c0_i32_0 : i32, i32
  }
  func.func @transform_6(%arg0: i32) -> (i32, i32) {
    %c0_i32 = arith.constant 0 : i32
    %c0_i32_0 = arith.constant 0 : i32
    %c0_i32_1 = arith.constant 0 : i32
    return %c0_i32, %c0_i32_0 : i32, i32
  }
  func.func @transform_7(%arg0: i32) -> (i32, i32) {
    %c0_i32 = arith.constant 0 : i32
    %c0_i32_0 = arith.constant 0 : i32
    %c0_i32_1 = arith.constant 0 : i32
    return %c0_i32, %c0_i32_0 : i32, i32
  }
  func.func @transform_8(%arg0: i32) -> (i32, i32) {
    %c0_i32 = arith.constant 0 : i32
    %c0_i32_0 = arith.constant 0 : i32
    %c0_i32_1 = arith.constant 0 : i32
    return %c0_i32, %c0_i32_0 : i32, i32
  }
  func.func @transform_9(%arg0: i32) -> (i32, i32) {
    %c0_i32 = arith.constant 0 : i32
    %c0_i32_0 = arith.constant 0 : i32
    %c0_i32_1 = arith.constant 0 : i32
    return %c0_i32, %c0_i32_0 : i32, i32
  }
  func.func @transform_10(%arg0: i32) -> (i32, i32) {
    %c0_i32 = arith.constant 0 : i32
    %c0_i32_0 = arith.constant 0 : i32
    %c0_i32_1 = arith.constant 0 : i32
    return %c0_i32, %c0_i32_0 : i32, i32
  }
  func.func @transform_11(%arg0: i32) -> (i32, i32) {
    %c0_i32 = arith.constant 0 : i32
    %c0_i32_0 = arith.constant 0 : i32
    return %c0_i32, %arg0 : i32, i32
  }
}

</mosaic_0001>

<bundles_post_ra>
// kernel: forward.1
= control target key start
LH: loop header
LB: loop body
LE: loop exit
PB: predicated region body
PF: predicated region fallthrough
CT: control target
= control target key end

     0   :  { %s1358_s21 = smov 111   ;;  %s1359_s26 = smov 113   ;;  %v1365_v4 = vmov 0   ;;  %v52_v6 = vlaneseq  ;;  %vm395_vm1 = vcmask 1043456   ;;  %vm391_vm9 = vcmask 588800   ;;  %s2190_s0 = inlined_call_operand.vmem [shape: f32[8,512], index: 0, kind: input, shape index: {}]   ;;  %s2191_s6 = inlined_call_operand.vmem [shape: f32[8,1], index: 6, kind: input, shape index: {}]   ;;  %s2192_s2 = inlined_call_operand.vmem [shape: f32[9,1,512], index: 2, kind: input, shape index: {}]   ;;  %s2193_s3 = inlined_call_operand.vmem [shape: f32[512,2], index: 3, kind: input, shape index: {}]   ;;  %s2194_s5 = inlined_call_operand.vmem [shape: bf16[8,72], index: 5, kind: input, shape index: {}]   ;;  %s2195_s8 = inlined_call_operand.vmem [shape: f32[8,1], index: 8, kind: input, shape index: {}]   ;;  %s2196_s7 = inlined_call_operand.vmem [shape: f32[8,8], index: 7, kind: input, shape index: {}]   ;;  %s2197_s4 = inlined_call_operand.vmem [shape: f32[2,512], index: 4, kind: input, shape index: {}]   ;;  %s2198_s1 = inlined_call_operand.vmem [shape: f32[8,512], index: 1, kind: input, shape index: {}]   ;;  %s2199_s10 = inlined_call_operand.vmem [shape: f32[8,1], index: 10, kind: input, shape index: {}]   ;;  %s2200_s9 = inlined_call_operand.vmem [shape: bf16[8,72], index: 9, kind: input, shape index: {}]   ;;  %s2201_s11 = inlined_call_operand.vmem [shape: f32[8,512], index: 11, kind: output, shape index: {}]  }
   0x1   :  { %v1433_v0 = vld [vmem:[%s2190_s0 + $0x10] sm:$0xff]  ;;  %v1438_v1 = vld [vmem:[%s2190_s0] sm:$0xff]  ;;  %v1447_v2 = vld [vmem:[%s2190_s0 + $0x18] sm:$0xff]  ;;  %s1361_s27 = smov 127   ;;  %s1362_s28 = smov 15   ;;  %440 = vmatprep.mubr.bf16.mxu0 %v1365_v4  ;;  %481 = vmatprep.mubr.bf16.mxu1 %v1365_v4  ;;  %vm1368_vm10 = vmmov 0  }
   0x2   :  { %329 = vrot.lane.b32.xlu1 %v1433_v0, %s1358_s21  ;;  %325 = vrot.lane.b32.xlu0 %v1438_v1, %s1358_s21  ;;  %v1452_v3 = vld [vmem:[%s2190_s0 + $0x8] sm:$0xff]  ;;  %s1360_s0 = smov 112   ;;  %s1363_s29 = smov 1   ;;  %v385_v5 = vld [vmem:[%s2191_s6] sm:$0xff]  ;;  %v1521_v7 = vshrl.u32 %v52_v6, 7  ;;  %v1523_v8 = vand.u32 127, %v52_v6 }
   0x3   :  { %s1364_s30 = smov 17   ;;  %1352 = vset.pattern.permute.xlu1 %v1365_v4  ;;  %1351 = vset.pattern.permute.xlu0 %v1365_v4  ;;  %s1366_s12 = smov 16   ;;  %v1245_v13 = vld [vmem:[%s2192_s2 + $0x20] sm:$0xf]  ;;  %v1244_v40 = vld [vmem:[%s2192_s2 + $0x1c] sm:$0xf] }
   0x4   :  { %v1526_v9 = vsub.s32 2, %v1521_v7  ;;  %v1529_v10 = vsub.s32 0, %v1521_v7  ;;  %v1532_v11 = vsub.s32 1, %v1521_v7  ;;  %v1535_v12 = vsub.s32 3, %v1521_v7  ;;  %v1243_v41 = vld [vmem:[%s2192_s2 + $0x18] sm:$0xf] }
   0x5   :  { %vm333_vm0 = vcmp.lt.s32.totalorder %v1523_v8, 111  ;;  %vm293_vm2 = vcmp.lt.s32.totalorder %v1523_v8, 112  ;;  %vm253_vm3 = vcmp.lt.s32.totalorder %v1523_v8, 113  ;;  %vm213_vm4 = vcmp.lt.s32.totalorder %v1523_v8, 127 }
   0x6   :  { %331 = vrot.lane.b32.xlu1 %v1447_v2, %s1358_s21  ;;  %327 = vrot.lane.b32.xlu0 %v1452_v3, %s1358_s21  ;;  %v1542_v16 = vrot.slane %v1245_v13, %v1526_v9  ;;  %v1545_v17 = vrot.slane %v1245_v13, %v1529_v10  ;;  %v1548_v18 = vrot.slane %v1245_v13, %v1532_v11  ;;  %vm133_vm5 = vcmp.lt.s32.totalorder %v1523_v8, 15 }
   0x7   :  { %v1551_v19 = vrot.slane %v1245_v13, %v1535_v12  ;;  %v1578_v42 = vrot.slane %v1243_v41, %v1535_v12  ;;  %v1581_v43 = vrot.slane %v1243_v41, %v1532_v11  ;;  %v1586_v47 = vrot.slane %v1243_v41, %v1526_v9 }
   0x8   :  { %v1591_v49 = vrot.slane %v1244_v40, %v1529_v10  ;;  %v1596_v51 = vrot.slane %v1244_v40, %v1535_v12  ;;  %v1599_v52 = vrot.slane %v1244_v40, %v1532_v11  ;;  %v1602_v53 = vrot.slane %v1244_v40, %v1526_v9 }
   0x9   :  { %v1605_v54 = vrot.slane %v1243_v41, %v1529_v10  ;;  %vm173_vm6 = vcmp.lt.s32.totalorder %v1523_v8, 1  ;;  %vm54_vm7 = vcmp.lt.s32.totalorder %v1523_v8, 17  ;;  %vm93_vm8 = vcmp.lt.s32.totalorder %v1523_v8, 16  ;;  %v979_v8 = vld [vmem:[%s2200_s9] sm:$0xf] }
   0xa   :  { %247 = vrot.lane.b32.xlu1 %v1452_v3, %s1359_s26  ;;  %245 = vrot.lane.b32.xlu0 %v1438_v1, %s1359_s26  ;;  %vm713_vm11 = vcmask 64512   ;;  %vm816_vm12 = vcmask 1041408   ;;  %vm812_vm13 = vcmask 15360  }
   0xe   :  { %251 = vrot.lane.b32.xlu1 %v1447_v2, %s1359_s26  ;;  %249 = vrot.lane.b32.xlu0 %v1433_v0, %s1359_s26 }
  0x12   :  { %287 = vrot.lane.b32.xlu1 %v1452_v3, %s1360_s0  ;;  %285 = vrot.lane.b32.xlu0 %v1438_v1, %s1360_s0 }
  0x16   :  { %291 = vrot.lane.b32.xlu1 %v1447_v2, %s1360_s0  ;;  %289 = vrot.lane.b32.xlu0 %v1433_v0, %s1360_s0 }
  0x1a   :  { %207 = vrot.lane.b32.xlu1 %v1452_v3, %s1361_s27  ;;  %205 = vrot.lane.b32.xlu0 %v1438_v1, %s1361_s27 }
  0x1e   :  { %211 = vrot.lane.b32.xlu1 %v1447_v2, %s1361_s27  ;;  %209 = vrot.lane.b32.xlu0 %v1433_v0, %s1361_s27 }
  0x22   :  { %127 = vrot.lane.b32.xlu1 %v1452_v3, %s1362_s28  ;;  %125 = vrot.lane.b32.xlu0 %v1438_v1, %s1362_s28 }
  0x26   :  { %131 = vrot.lane.b32.xlu1 %v1447_v2, %s1362_s28  ;;  %129 = vrot.lane.b32.xlu0 %v1433_v0, %s1362_s28 }
  0x2a   :  { %167 = vrot.lane.b32.xlu1 %v1452_v3, %s1363_s29  ;;  %165 = vrot.lane.b32.xlu0 %v1438_v1, %s1363_s29 }
  0x2e   :  { %171 = vrot.lane.b32.xlu1 %v1447_v2, %s1363_s29  ;;  %169 = vrot.lane.b32.xlu0 %v1433_v0, %s1363_s29 }
  0x32   :  { %46 = vrot.lane.b32.xlu1 %v1452_v3, %s1364_s30  ;;  %44 = vrot.lane.b32.xlu0 %v1438_v1, %s1364_s30 }
  0x36   :  { %50 = vrot.lane.b32.xlu1 %v1447_v2, %s1364_s30  ;;  %48 = vrot.lane.b32.xlu0 %v1433_v0, %s1364_s30 }
  0x3a   :  { %87 = vrot.lane.b32.xlu1 %v1452_v3, %s1366_s12  ;;  %85 = vrot.lane.b32.xlu0 %v1438_v1, %s1366_s12 }
  0x3e   :  { %91 = vrot.lane.b32.xlu1 %v1447_v2, %s1366_s12  ;;  %89 = vrot.lane.b32.xlu0 %v1433_v0, %s1366_s12 }
  0x42   :  { %388 = vperm.xlu1 %1352, %v385_v5  }
  0x74   :  { %v330_v14 = vpop.permute.xlu1 %329  ;;  %v326_v15 = vpop.permute.xlu0 %325 }
  0x78   :  { %v332_v20 = vpop.permute.xlu1 %331  ;;  %v328_v21 = vpop.permute.xlu0 %327 }
  0x79   :  { %v334_v22 = vsel %vm333_vm0, %v330_v14, %v332_v20  ;;  %v337_v23 = vsel %vm333_vm0, %v332_v20, %v326_v15  ;;  %v335_v24 = vsel %vm333_vm0, %v328_v21, %v330_v14  ;;  %v336_v25 = vsel %vm333_vm0, %v326_v15, %v328_v21  ;;  %v1242_v20 = vld [vmem:[%s2192_s2 + $0x14] sm:$0xf] }
  0x7a   :  { %v363_v26 = vmul.f32 %v1542_v16, %v334_v22  ;;  %v361_v27 = vmul.f32 %v1545_v17, %v336_v25  ;;  %v362_v28 = vmul.f32 %v1548_v18, %v335_v24  ;;  %v364_v29 = vmul.f32 %v1551_v19, %v337_v23 }
  0x7c   :  { %v248_v30 = vpop.permute.xlu1 %247  ;;  %v246_v31 = vpop.permute.xlu0 %245  ;;  %v382_v32 = vpack.c.bf16 %v362_v28, %v362_v28  ;;  %v384_v33 = vpack.c.bf16 %v364_v29, %v364_v29  ;;  %v381_v34 = vpack.c.bf16 %v361_v27, %v361_v27  ;;  %v383_v35 = vpack.c.bf16 %v363_v26, %v363_v26 }
  0x7d   :  { %v256_v56 = vsel %vm253_vm3, %v246_v31, %v248_v30  ;;  %v1630_v27 = vrot.slane %v1242_v20, %v1529_v10  ;;  %v1633_v29 = vrot.slane %v1242_v20, %v1535_v12 }
  0x7e   :  { %1246 = vmatprep.subr.msk.bf16.mxu0 %vm395_vm1, %v382_v32  ;;  %1248 = vmatprep.subr.msk.bf16.mxu1 %vm395_vm1, %v384_v33  ;;  %v397_v36 = vsel %vm395_vm1, %v381_v34, 0  ;;  %v403_v37 = vsel %vm395_vm1, %v383_v35, 0  ;;  %v281_v21 = vmul.f32 %v1605_v54, %v256_v56  ;;  %v1641_v32 = vrot.slane %v1242_v20, %v1526_v9  ;;  %v1240_v56 = vld [vmem:[%s2192_s2 + $0x8] sm:$0xf] }
  0x7f   :  { %415 = vmatpush1.bf16.msra.mxu0 %v397_v36  ;;  %456 = vmatpush1.bf16.msra.mxu1 %v403_v37 }
  0x80   :  { %v252_v38 = vpop.permute.xlu1 %251  ;;  %v250_v39 = vpop.permute.xlu0 %249 }
  0x81   :  { %v257_v46 = vsel %vm253_vm3, %v252_v38, %v246_v31  ;;  %v255_v48 = vsel %vm253_vm3, %v248_v30, %v250_v39  ;;  %v254_v55 = vsel %vm253_vm3, %v250_v39, %v252_v38  ;;  %v1638_v31 = vrot.slane %v1242_v20, %v1532_v11 }
  0x82   :  { %v284_v57 = vmul.f32 %v1578_v42, %v257_v46  ;;  %v282_v58 = vmul.f32 %v1581_v43, %v255_v48  ;;  %v283_v6 = vmul.f32 %v1586_v47, %v254_v55 }
  0x84   :  { %v288_v44 = vpop.permute.xlu1 %287  ;;  %v286_v45 = vpop.permute.xlu0 %285 }
  0x85   :  { %v296_v50 = vsel %vm293_vm2, %v286_v45, %v288_v44 }
  0x86   :  { %v321_v61 = vmul.f32 %v1591_v49, %v296_v50 }
  0x88   :  { %v292_v59 = vpop.permute.xlu1 %291  ;;  %v290_v60 = vpop.permute.xlu0 %289  ;;  %v377_v28 = vpack.c.bf16 %v321_v61, %v281_v21 }
  0x89   :  { %v297_v62 = vsel %vm293_vm2, %v292_v59, %v286_v45  ;;  %v294_v63 = vsel %vm293_vm2, %v290_v60, %v292_v59  ;;  %v295_v5 = vsel %vm293_vm2, %v288_v44, %v290_v60  ;;  %v1665_v60 = vrot.slane %v1240_v56, %v1532_v11 }
  0x8a   :  { %v324_v13 = vmul.f32 %v1596_v51, %v297_v62  ;;  %v322_v14 = vmul.f32 %v1599_v52, %v295_v5  ;;  %v323_v15 = vmul.f32 %v1602_v53, %v294_v63  ;;  %v1674_v63 = vrot.slane %v1240_v56, %v1529_v10 }
  0x8b   :  { %v1677_v5 = vrot.slane %v1240_v56, %v1526_v9 }
  0x8c   :  { %v208_v22 = vpop.permute.xlu1 %207  ;;  %v206_v23 = vpop.permute.xlu0 %205  ;;  %v378_v24 = vpack.c.bf16 %v322_v14, %v282_v58  ;;  %v380_v25 = vpack.c.bf16 %v324_v13, %v284_v57  ;;  %v379_v26 = vpack.c.bf16 %v323_v15, %v283_v6  ;;  %v1241_v57 = vld [vmem:[%s2192_s2 + $0xc] sm:$0xf]  ;;  %v1680_v6 = vrot.slane %v1240_v56, %v1535_v12 }
  0x8d   :  { %v216_v30 = vsel %vm213_vm4, %v206_v23, %v208_v22  ;;  %v1669_v61 = vrot.slane %v1241_v57, %v1532_v11  ;;  %v1687_v21 = vrot.slane %v1241_v57, %v1529_v10 }
  0x8e   :  { %416 = vmatprep.subr.bf16.mxu0 %v378_v24  ;;  %457 = vmatprep.subr.bf16.mxu1 %v380_v25  ;;  %v241_v35 = vmul.f32 %v1630_v27, %v216_v30 }
  0x8f   :  { %417 = vmatpush1.bf16.msra.mxu0 %v377_v28  ;;  %458 = vmatpush1.bf16.msra.mxu1 %v379_v26  ;;  %v1697_v26 = vrot.slane %v1241_v57, %v1535_v12 }
  0x90   :  { %v212_v33 = vpop.permute.xlu1 %211  ;;  %v210_v34 = vpop.permute.xlu0 %209  ;;  %v373_v55 = vpack.c.bf16 %v241_v35, %v1438_v1 }
  0x91   :  { %v217_v36 = vsel %vm213_vm4, %v212_v33, %v206_v23  ;;  %v214_v37 = vsel %vm213_vm4, %v210_v34, %v212_v33  ;;  %v215_v38 = vsel %vm213_vm4, %v208_v22, %v210_v34  ;;  %v1690_v22 = vrot.slane %v1241_v57, %v1526_v9  ;;  %v59_v57 = vld [vmem:[%s2192_s2] sm:$0xf] }
  0x92   :  { %v244_v39 = vmul.f32 %v1633_v29, %v217_v36  ;;  %v242_v40 = vmul.f32 %v1638_v31, %v215_v38  ;;  %v243_v41 = vmul.f32 %v1641_v32, %v214_v37 }
  0x94   :  { %v128_v44 = vpop.permute.xlu1 %127  ;;  %v126_v45 = vpop.permute.xlu0 %125  ;;  %v374_v46 = vpack.c.bf16 %v242_v40, %v1452_v3  ;;  %v376_v48 = vpack.c.bf16 %v244_v39, %v1447_v2  ;;  %v375_v50 = vpack.c.bf16 %v243_v41, %v1433_v0 }
  0x95   :  { %v136_v62 = vsel %vm133_vm5, %v126_v45, %v128_v44 }
  0x96   :  { %418 = vmatprep.subr.bf16.mxu0 %v374_v46  ;;  %459 = vmatprep.subr.bf16.mxu1 %v376_v48  ;;  %v162_v23 = vmul.f32 %v1665_v60, %v136_v62 }
  0x97   :  { %419 = vmatpush1.bf16.msra.mxu0 %v373_v55  ;;  %460 = vmatpush1.bf16.msra.mxu1 %v375_v50 }
  0x98   :  { %v132_v58 = vpop.permute.xlu1 %131  ;;  %v130_v59 = vpop.permute.xlu0 %129 }
  0x99   :  { %v137_v15 = vsel %vm133_vm5, %v132_v58, %v126_v45  ;;  %v135_v24 = vsel %vm133_vm5, %v128_v44, %v130_v59  ;;  %v134_v28 = vsel %vm133_vm5, %v130_v59, %v132_v58  ;;  %v1239_v58 = vld [vmem:[%s2192_s2 + $0x4] sm:$0xf] }
  0x9a   :  { %v161_v30 = vmul.f32 %v1674_v63, %v137_v15  ;;  %v163_v36 = vmul.f32 %v1677_v5, %v135_v24  ;;  %v164_v40 = vmul.f32 %v1680_v6, %v134_v28  ;;  %v1736_v24 = vrot.slane %v59_v57, %v1535_v12 }
  0x9c   :  { %v168_v13 = vpop.permute.xlu1 %167  ;;  %v166_v14 = vpop.permute.xlu0 %165 }
  0x9d   :  { %v176_v20 = vsel %vm173_vm6, %v166_v14, %v168_v13 }
  0x9e   :  { %v202_v25 = vmul.f32 %v1669_v61, %v176_v20  ;;  %v1730_v20 = vrot.slane %v59_v57, %v1529_v10 }
  0xa0   :  { %v172_v33 = vpop.permute.xlu1 %171  ;;  %v170_v34 = vpop.permute.xlu0 %169  ;;  %v370_v35 = vpack.c.bf16 %v202_v25, %v162_v23  ;;  %v1733_v23 = vrot.slane %v59_v57, %v1526_v9 }
  0xa1   :  { %v177_v37 = vsel %vm173_vm6, %v172_v33, %v166_v14  ;;  %v174_v38 = vsel %vm173_vm6, %v170_v34, %v172_v33  ;;  %v175_v39 = vsel %vm173_vm6, %v168_v13, %v170_v34  ;;  %v1721_v13 = vrot.slane %v59_v57, %v1532_v11 }
  0xa2   :  { %v201_v41 = vmul.f32 %v1687_v21, %v177_v37  ;;  %v203_v44 = vmul.f32 %v1690_v22, %v175_v39  ;;  %v204_v45 = vmul.f32 %v1697_v26, %v174_v38  ;;  %420 = vmatprep.subr.bf16.mxu0 %v370_v35  ;;  %v1725_v14 = vrot.slane %v1239_v58, %v1532_v11 }
  0xa3   :  { %v1743_v33 = vrot.slane %v1239_v58, %v1529_v10  ;;  %v1746_v34 = vrot.slane %v1239_v58, %v1526_v9  ;;  %v1753_v38 = vrot.slane %v1239_v58, %v1535_v12 }
  0xa4   :  { %v47_v46 = vpop.permute.xlu1 %46  ;;  %v45_v48 = vpop.permute.xlu0 %44  ;;  %v369_v50 = vpack.c.bf16 %v201_v41, %v161_v30  ;;  %v372_v55 = vpack.c.bf16 %v204_v45, %v164_v40  ;;  %v371_v56 = vpack.c.bf16 %v203_v44, %v163_v36 }
  0xa5   :  { %v57_v15 = vsel %vm54_vm7, %v45_v48, %v47_v46 }
  0xa6   :  { %421 = vmatpush1.bf16.msra.mxu0 %v369_v50  ;;  %461 = vmatprep.subr.bf16.mxu1 %v372_v55  ;;  %v82_v35 = vmul.f32 %v1721_v13, %v57_v15  ;;  %v565_v15 = vld [vmem:[%s2193_s3 + $0x1f8] sm:$0xff] }
  0xa7   :  { %462 = vmatpush1.bf16.msra.mxu1 %v371_v56 }
  0xa8   :  { %v51_v59 = vpop.permute.xlu1 %50  ;;  %v49_v62 = vpop.permute.xlu0 %48 }
  0xa9   :  { %v58_v30 = vsel %vm54_vm7, %v51_v59, %v45_v48  ;;  %v56_v36 = vsel %vm54_vm7, %v47_v46, %v49_v62  ;;  %v55_v39 = vsel %vm54_vm7, %v49_v62, %v51_v59  ;;  %v533_v62 = vld [vmem:[%s2193_s3 + $0xf8] sm:$0xff] }
  0xaa   :  { %v81_v40 = vmul.f32 %v1730_v20, %v58_v30  ;;  %v83_v9 = vmul.f32 %v1733_v23, %v56_v36  ;;  %v84_v48 = vmul.f32 %v1736_v24, %v55_v39  ;;  %v532_v30 = vld [vmem:[%s2193_s3 + $0xf0] sm:$0xff] }
  0xab   :  { %v564_v36 = vld [vmem:[%s2193_s3 + $0x1f0] sm:$0xff] }
  0xac   :  { %v88_v25 = vpop.permute.xlu1 %87  ;;  %v86_v28 = vpop.permute.xlu0 %85  ;;  %v548_v39 = vld [vmem:[%s2193_s3 + $0x170] sm:$0xff] }
  0xad   :  { %v96_v11 = vsel %vm93_vm8, %v86_v28, %v88_v25 }
  0xae   :  { %v122_v37 = vmul.f32 %v1725_v14, %v96_v11  ;;  %v549_v11 = vld [vmem:[%s2193_s3 + $0x178] sm:$0xff] }
  0xb0   :  { %v92_v10 = vpop.permute.xlu1 %91  ;;  %v90_v41 = vpop.permute.xlu0 %89  ;;  %v366_v44 = vpack.c.bf16 %v122_v37, %v82_v35  ;;  %v516_v35 = vld [vmem:[%s2193_s3 + $0x70] sm:$0xff]  ;;  %v531_v37 = vld [vmem:[%s2193_s3 + $0xe8] sm:$0xff] }
  0xb1   :  { %v97_v45 = vsel %vm93_vm8, %v92_v10, %v86_v28  ;;  %v94_v46 = vsel %vm93_vm8, %v90_v41, %v92_v10  ;;  %v95_v12 = vsel %vm93_vm8, %v88_v25, %v90_v41  ;;  %v43_v25 = vld [vmem:[%s2194_s5] sm:$0xf]  ;;  %v517_v28 = vld [vmem:[%s2193_s3 + $0x78] sm:$0xff]  ;;  %v563_v10 = vld [vmem:[%s2193_s3 + $0x1e8] sm:$0xff] }
  0xb2   :  { %v121_v50 = vmul.f32 %v1743_v33, %v97_v45  ;;  %v123_v55 = vmul.f32 %v1746_v34, %v95_v12  ;;  %v124_v56 = vmul.f32 %v1753_v38, %v94_v46  ;;  %422 = vmatprep.subr.bf16.mxu0 %v366_v44  ;;  %v530_v41 = vld [vmem:[%s2193_s3 + $0xe0] sm:$0xff]  ;;  %v547_v44 = vld [vmem:[%s2193_s3 + $0x168] sm:$0xff]  ;;  %v529_v46 = vld [vmem:[%s2193_s3 + $0xd8] sm:$0xff] }
  0xb3   :  { %v562_v45 = vld [vmem:[%s2193_s3 + $0x1e0] sm:$0xff] }
  0xb4   :  { %v365_v57 = vpack.c.bf16 %v121_v50, %v81_v40  ;;  %v368_v58 = vpack.c.bf16 %v124_v56, %v84_v48  ;;  %v367_v59 = vpack.c.bf16 %v123_v55, %v83_v9  ;;  %v515_v40 = vld [vmem:[%s2193_s3 + $0x68] sm:$0xff]  ;;  %v514_v9 = vld [vmem:[%s2193_s3 + $0x60] sm:$0xff]  ;;  %v513_v48 = vld [vmem:[%s2193_s3 + $0x58] sm:$0xff] }
  0xb5   :  { %v546_v12 = vld [vmem:[%s2193_s3 + $0x160] sm:$0xff]  ;;  %v561_v50 = vld [vmem:[%s2193_s3 + $0x1d8] sm:$0xff]  ;;  %v528_v55 = vld [vmem:[%s2193_s3 + $0xd0] sm:$0xff] }
  0xb6   :  { %423 = vmatpush1.bf16.msra.mxu0 %v365_v57  ;;  %463 = vmatprep.subr.bf16.mxu1 %v368_v58  ;;  %v545_v56 = vld [vmem:[%s2193_s3 + $0x158] sm:$0xff]  ;;  %v512_v57 = vld [vmem:[%s2193_s3 + $0x50] sm:$0xff] }
  0xb7   :  { %464 = vmatpush1.bf16.msra.mxu1 %v367_v59  ;;  %1262 = vmatprep.subr.mxu0 %v533_v62  ;;  %v560_v58 = vld [vmem:[%s2193_s3 + $0x1d0] sm:$0xff]  ;;  %v527_v59 = vld [vmem:[%s2193_s3 + $0xc8] sm:$0xff] }
  0xb8   :  { %1297 = vmatprep.subr.mxu1 %v565_v15  ;;  %v544_v62 = vld [vmem:[%s2193_s3 + $0x150] sm:$0xff]  ;;  %v511_v15 = vld [vmem:[%s2193_s3 + $0x48] sm:$0xff] }
  0xb9   :  { %1247 = vmatmul.mubr.msk.bf16.vlgmr.msra.gmra.mxu0 %vm391_vm9, %v43_v25 }
  0xba   :  { %1249 = vmatmul.mubr.msk.bf16.vlgmr.msra.gmra.mxu1 %vm391_vm9, %v43_v25  ;;  %1263 = vmatpush3.msra.mxu0 %v517_v28  ;;  %v559_v25 = vld [vmem:[%s2193_s3 + $0x1c8] sm:$0xff]  ;;  %v526_v28 = vld [vmem:[%s2193_s3 + $0xc0] sm:$0xff] }
  0xbb   :  { %1264 = vmatprep.subr.mxu0 %v532_v30  ;;  %1298 = vmatpush3.msra.mxu1 %v549_v11  ;;  %v543_v30 = vld [vmem:[%s2193_s3 + $0x148] sm:$0xff]  ;;  %v510_v11 = vld [vmem:[%s2193_s3 + $0x40] sm:$0xff] }
  0xbc   :  { %1265 = vmatpush3.msra.mxu0 %v516_v35  ;;  %1299 = vmatprep.subr.mxu1 %v564_v36  ;;  %v558_v35 = vld [vmem:[%s2193_s3 + $0x1c0] sm:$0xff]  ;;  %v525_v36 = vld [vmem:[%s2193_s3 + $0xb8] sm:$0xff] }
  0xbd   :  { %1266 = vmatprep.subr.mxu0 %v531_v37  ;;  %1300 = vmatpush3.msra.mxu1 %v548_v39  ;;  %v542_v37 = vld [vmem:[%s2193_s3 + $0x140] sm:$0xff]  ;;  %v509_v39 = vld [vmem:[%s2193_s3 + $0x38] sm:$0xff] }
  0xbe   :  { %1267 = vmatpush3.msra.mxu0 %v515_v40  ;;  %1301 = vmatprep.subr.mxu1 %v563_v10  ;;  %v557_v40 = vld [vmem:[%s2193_s3 + $0x1b8] sm:$0xff]  ;;  %v524_v10 = vld [vmem:[%s2193_s3 + $0xb0] sm:$0xff] }
  0xbf   :  { %1268 = vmatprep.subr.mxu0 %v530_v41  ;;  %1302 = vmatpush3.msra.mxu1 %v547_v44  ;;  %v541_v41 = vld [vmem:[%s2193_s3 + $0x138] sm:$0xff]  ;;  %v508_v44 = vld [vmem:[%s2193_s3 + $0x30] sm:$0xff] }
  0xc0   :  { %1269 = vmatpush3.msra.mxu0 %v514_v9  ;;  %1303 = vmatprep.subr.mxu1 %v562_v45  ;;  %v556_v9 = vld [vmem:[%s2193_s3 + $0x1b0] sm:$0xff]  ;;  %v523_v45 = vld [vmem:[%s2193_s3 + $0xa8] sm:$0xff] }
  0xc1   :  { %1270 = vmatprep.subr.mxu0 %v529_v46  ;;  %1304 = vmatpush3.msra.mxu1 %v546_v12  ;;  %v540_v46 = vld [vmem:[%s2193_s3 + $0x130] sm:$0xff]  ;;  %v507_v12 = vld [vmem:[%s2193_s3 + $0x28] sm:$0xff] }
  0xc2   :  { %1271 = vmatpush3.msra.mxu0 %v513_v48  ;;  %1305 = vmatprep.subr.mxu1 %v561_v50  ;;  %v555_v48 = vld [vmem:[%s2193_s3 + $0x1a8] sm:$0xff]  ;;  %v522_v50 = vld [vmem:[%s2193_s3 + $0xa0] sm:$0xff] }
  0xc3   :  { %1272 = vmatprep.subr.mxu0 %v528_v55  ;;  %1306 = vmatpush3.msra.mxu1 %v545_v56  ;;  %v539_v55 = vld [vmem:[%s2193_s3 + $0x128] sm:$0xff]  ;;  %v506_v56 = vld [vmem:[%s2193_s3 + $0x20] sm:$0xff] }
  0xc4   :  { %1273 = vmatpush3.msra.mxu0 %v512_v57  ;;  %1307 = vmatprep.subr.mxu1 %v560_v58  ;;  %v554_v57 = vld [vmem:[%s2193_s3 + $0x1a0] sm:$0xff]  ;;  %v521_v58 = vld [vmem:[%s2193_s3 + $0x98] sm:$0xff] }
  0xc5   :  { %1274 = vmatprep.subr.mxu0 %v527_v59  ;;  %1308 = vmatpush3.msra.mxu1 %v544_v62  ;;  %v538_v59 = vld [vmem:[%s2193_s3 + $0x120] sm:$0xff]  ;;  %v505_v62 = vld [vmem:[%s2193_s3 + $0x18] sm:$0xff] }
  0xc6   :  { %1275 = vmatpush3.msra.mxu0 %v511_v15  ;;  %1309 = vmatprep.subr.mxu1 %v559_v25  ;;  %v553_v15 = vld [vmem:[%s2193_s3 + $0x198] sm:$0xff]  ;;  %v520_v25 = vld [vmem:[%s2193_s3 + $0x90] sm:$0xff] }
  0xc7   :  { %1276 = vmatprep.subr.mxu0 %v526_v28  ;;  %1310 = vmatpush3.msra.mxu1 %v543_v30  ;;  %v537_v28 = vld [vmem:[%s2193_s3 + $0x118] sm:$0xff]  ;;  %v504_v30 = vld [vmem:[%s2193_s3 + $0x10] sm:$0xff] }
  0xc8   :  { %1277 = vmatpush3.msra.mxu0 %v510_v11  ;;  %1311 = vmatprep.subr.mxu1 %v558_v35  ;;  %v552_v11 = vld [vmem:[%s2193_s3 + $0x190] sm:$0xff]  ;;  %v519_v35 = vld [vmem:[%s2193_s3 + $0x88] sm:$0xff] }
  0xc9   :  { %1278 = vmatprep.subr.mxu0 %v525_v36  ;;  %1312 = vmatpush3.msra.mxu1 %v542_v37  ;;  %v536_v36 = vld [vmem:[%s2193_s3 + $0x110] sm:$0xff]  ;;  %v503_v37 = vld [vmem:[%s2193_s3 + $0x8] sm:$0xff] }
  0xca   :  { %1279 = vmatpush3.msra.mxu0 %v509_v39  ;;  %1313 = vmatprep.subr.mxu1 %v557_v40  ;;  %v551_v39 = vld [vmem:[%s2193_s3 + $0x188] sm:$0xff]  ;;  %v518_v40 = vld [vmem:[%s2193_s3 + $0x80] sm:$0xff] }
  0xcb   :  { %1280 = vmatprep.subr.mxu0 %v524_v10  ;;  %1314 = vmatpush3.msra.mxu1 %v541_v41  ;;  %v535_v10 = vld [vmem:[%s2193_s3 + $0x108] sm:$0xff]  ;;  %v502_v41 = vld [vmem:[%s2193_s3] sm:$0xff] }
  0xcc   :  { %1281 = vmatpush3.msra.mxu0 %v508_v44  ;;  %1315 = vmatprep.subr.mxu1 %v556_v9  ;;  %v550_v44 = vld [vmem:[%s2193_s3 + $0x180] sm:$0xff] }
  0xcd   :  { %1282 = vmatprep.subr.mxu0 %v523_v45  ;;  %1316 = vmatpush3.msra.mxu1 %v540_v46  ;;  %v534_v9 = vld [vmem:[%s2193_s3 + $0x100] sm:$0xff]  ;;  %v1367_v45 = vmov 0.0  }
  0xce   :  { %1283 = vmatpush3.msra.mxu0 %v507_v12  ;;  %1317 = vmatprep.subr.mxu1 %v555_v48  ;;  %v707_v46 = vld [vmem:[%s2195_s8] sm:$0xff] }
  0xcf   :  { %1284 = vmatprep.subr.mxu0 %v522_v50  ;;  %1318 = vmatpush3.msra.mxu1 %v539_v55 }
  0xd0   :  { %1285 = vmatpush3.msra.mxu0 %v506_v56  ;;  %1319 = vmatprep.subr.mxu1 %v554_v57 }
  0xd1   :  { %1286 = vmatprep.subr.mxu0 %v521_v58  ;;  %1320 = vmatpush3.msra.mxu1 %v538_v59 }
  0xd2   :  { %1287 = vmatpush3.msra.mxu0 %v505_v62  ;;  %1321 = vmatprep.subr.mxu1 %v553_v15 }
  0xd3   :  { %1288 = vmatprep.subr.mxu0 %v520_v25  ;;  %1322 = vmatpush3.msra.mxu1 %v537_v28  ;;  %v706_v28 = vld [vmem:[%s2196_s7] sm:$0xff] }
  0xd4   :  { %1289 = vmatpush3.msra.mxu0 %v504_v30  ;;  %1323 = vmatprep.subr.mxu1 %v552_v11  ;;  %v793_v30 = vld [vmem:[%s2197_s4] sm:$0xff]  ;;  %v1369_v11 = vmov 1983009808  }
  0xd5   :  { %1290 = vmatprep.subr.mxu0 %v519_v35  ;;  %1324 = vmatpush3.msra.mxu1 %v536_v36  ;;  %v797_v35 = vunpack.c.l.s4 %v1369_v11  ;;  %v967_v11 = vld [vmem:[%s2198_s1] sm:$0xff] }
  0xd6   :  { %1291 = vmatpush3.msra.mxu0 %v503_v37  ;;  %1325 = vmatprep.subr.mxu1 %v551_v39  ;;  %v795_v37 = vcombine.high %v793_v30, %v793_v30 }
  0xd7   :  { %1292 = vmatprep.subr.mxu0 %v518_v40  ;;  %1326 = vmatpush3.msra.mxu1 %v535_v10  ;;  %v798_v36 = vunpack.c.0.s8 %v797_v35 }
  0xd8   :  { %1293 = vmatpush3.msra.mxu0 %v502_v41  ;;  %630 = vmatprep.mubr.f32.mxu0 %v1452_v3 }
  0xd9   :  { %1327 = vmatprep.subr.mxu1 %v550_v44  ;;  %631 = vmatmul.mubr.f32.vlgmr.msra.gmra.mxu0 %v1438_v1  ;;  %v801_v39 = vsub.s32 %v798_v36, %v1521_v7 }
  0xda   :  { %1328 = vmatpush3.msra.mxu1 %v534_v9  ;;  %700 = vmatprep.mubr.f32.mxu1 %v1447_v2 }
  0xdb   :  { %701 = vmatmul.mubr.f32.vlgmr.msra.gmra.mxu1 %v1433_v0  ;;  %1334 = vmatprep.subr.mxu0 %v1367_v45  ;;  %v802_v40 = vrot.slane %v793_v30, %v801_v39  ;;  %v809_v10 = vrot.slane %v795_v37, %v801_v39 }
  0xdc   :  { %889 = vmatprep.mubr.f32.mxu1 %v1367_v45  ;;  %1336 = vmatprep.mubr.msk.f32.mxu0 %vm1368_vm10, %v1367_v45 }
  0xdd   :  { %710 = vperm.xlu0 %1351, %v707_v46   ;;  %v810_v41 = vcombine.high %v802_v40, %v802_v40  ;;  %v811_v44 = vcombine.high %v809_v10, %v809_v10 }
  0xdf   :  { %1252 = vmatprep.subr.msk.mxu1 %vm816_vm12, %v810_v41 }
  0xe0   :  { %1253 = vmatpush1.msk.msra.mxu1 %vm816_vm12, %v802_v40 }
 0x158   :  { %v711_v9 = vpop.permute.xlu0 %710 }
 0x179   :  { %v442_v12 = vpop.f32.mrf.mxu0 }
 0x17a   :  { %v483_v3 = vpop.f32.mrf.mxu1 }
 0x17b   :  { %v444_v48 = vpop.f32.mrf.mxu0 }
 0x17c   :  { %v485_v50 = vpop.f32.mrf.mxu1 }
 0x17d   :  { %v446_v1 = vpop.f32.mrf.mxu0 }
 0x17e   :  { %v487_v55 = vpop.f32.mrf.mxu1 }
 0x17f   :  { %v447_v56 = vpop.f32.mrf.mxu0 }
 0x180   :  { %v488_v2 = vpop.f32.mrf.mxu1 }
 0x199   :  { %v1294_v57 = vpop.f32.mrf.mxu0 }
 0x19b   :  { %v1329_v0 = vpop.f32.mrf.mxu1  ;;  %v1295_v58 = vpop.f32.mrf.mxu0 }
 0x19c   :  { %v1296_v59 = vadd.f32 %v1295_v58, %v1294_v57  ;;  %v389_v57 = vpop.permute.xlu1 %388 }
 0x19d   :  { %v1330_v62 = vpop.f32.mrf.mxu1  ;;  %v445_v58 = vadd.f32 %v444_v48, %v389_v57 }
 0x19e   :  { %v1331_v15 = vadd.f32 %v1330_v62, %v1329_v0  ;;  %v443_v0 = vadd.f32 %v442_v12, %v389_v57  ;;  %v484_v62 = vadd.f32 %v483_v3, %v389_v57 }
 0x19f   :  { %vm491_vm15 = vcmp.ge.f32.partialorder %v445_v58, 0.0 }
 0x1a0   :  { %v703_v25 = vadd.f32 %v1331_v15, %v1296_v59  ;;  %v494_v59 = vmul.f32 0.2, %v443_v0  ;;  %vm490_vm14 = vcmp.ge.f32.partialorder %v443_v0, 0.0  ;;  %v495_v15 = vmul.f32 0.2, %v445_v58 }
 0x1a1   :  { %vm492_vm10 = vcmp.ge.f32.partialorder %v484_v62, 0.0 }
 0x1a2   :  { %1335 = vmatpush3.msra.mxu0 %v703_v25  ;;  %v486_v25 = vadd.f32 %v485_v50, %v389_v57  ;;  %v498_v30 = vsel %vm490_vm14, %v443_v0, %v494_v59  ;;  %v499_v36 = vsel %vm491_vm15, %v445_v58, %v495_v15  ;;  %v969_v50 = vld [vmem:[%s2198_s1 + $0x10] sm:$0xff] }
 0x1a3   :  { %1337 = vmatmul.mubr.msk.f32.vlgmr.msra.gmra.mxu0 %vm713_vm11, %v706_v28  ;;  %1255 = vmatprep.subr.msk.mxu0 %vm816_vm12, %v811_v44  ;;  %v496_v28 = vmul.f32 0.2, %v484_v62  ;;  %v971_v12 = vadd.f32 %v967_v11, %v498_v30  ;;  %v970_v44 = vld [vmem:[%s2198_s1 + $0x18] sm:$0xff] }
 0x1a4   :  { %960 = vmatprep.mubr.f32.mxu0 %v1367_v45  ;;  %1256 = vmatpush1.msk.msra.mxu0 %vm816_vm12, %v809_v10  ;;  %v497_v35 = vmul.f32 0.2, %v486_v25  ;;  %vm493_vm11 = vcmp.ge.f32.partialorder %v486_v25, 0.0 }
 0x1a5   :  { %v500_v48 = vsel %vm492_vm10, %v484_v62, %v496_v28 }
 0x1a6   :  { %v501_v41 = vsel %vm493_vm11, %v486_v25, %v497_v35 }
 0x263   :  { %v783_v45 = vpop.f32.mrf.mxu0 }
 0x264   :  { %v784_v46 = vadd.f32 %v783_v45, %v711_v9  ;;  %v973_v9 = vadd.f32 %v969_v50, %v500_v48 }
 0x265   :  { %v1338_v1 = vpop.f32.mrf.mxu0 }
 0x266   :  { %v1251_v55 = vmul.f32 -1.442695, %v784_v46 }
 0x268   :  { %1354 = vpow2.f32 %v1251_v55  ;;  %v974_v55 = vadd.f32 %v970_v44, %v501_v41 }
 0x275   :  { %v1355_v56 = vpop.eup %1354 }
 0x276   :  { %v790_v2 = vadd.f32 1.0, %v1355_v56 }
 0x278   :  { %1356 = vrcp.f32 %v790_v2  ;;  %v1128_v2 = vld [vmem:[%s2199_s10] sm:$0xff] }
 0x285   :  { %v1357_v7 = vpop.eup %1356 }
 0x286   :  { %1254 = vmatmul.mubr.msk.f32.vlgmr.msra.gmra.mxu1 %vm812_vm13, %v1357_v7  ;;  %1257 = vmatmul.mubr.msk.f32.vlgmr.msra.gmra.mxu0 %vm812_vm13, %v1357_v7 }
 0x287   :  { %1181 = vmatprep.mubr.bf16.mxu1 %v1365_v4  ;;  %1222 = vmatprep.mubr.bf16.mxu0 %v1365_v4  ;;  %v968_v4 = vld [vmem:[%s2198_s1 + $0x8] sm:$0xff] }
 0x288   :  { %v972_v40 = vadd.f32 %v968_v4, %v499_v36 }
 0x346   :  { %v891_v3 = vpop.f32.mrf.mxu1  ;;  %v962_v37 = vpop.f32.mrf.mxu0 }
 0x347   :  { %v1991_v39 = vmul.f32 %v971_v12, %v891_v3  ;;  %v2000_v1 = vmul.f32 %v973_v9, %v962_v37 }
 0x348   :  { %v893_v10 = vpop.f32.mrf.mxu1  ;;  %v964_v46 = vpop.f32.mrf.mxu0 }
 0x349   :  { %v1996_v45 = vmul.f32 %v972_v40, %v893_v10  ;;  %1092 = vrot.lane.b32.xlu1 %v1991_v39, %s1358_s21  ;;  %v2004_v56 = vmul.f32 %v974_v55, %v964_v46 }
 0x34b   :  { %1094 = vrot.lane.b32.xlu0 %v1996_v45, %s1358_s21 }
 0x34d   :  { %1096 = vrot.lane.b32.xlu1 %v2000_v1, %s1358_s21 }
 0x34f   :  { %1098 = vrot.lane.b32.xlu0 %v2004_v56, %s1358_s21 }
 0x351   :  { %1060 = vrot.lane.b32.xlu1 %v1991_v39, %s1359_s26 }
 0x353   :  { %1062 = vrot.lane.b32.xlu0 %v1996_v45, %s1359_s26 }
 0x355   :  { %1064 = vrot.lane.b32.xlu1 %v2000_v1, %s1359_s26 }
 0x357   :  { %1066 = vrot.lane.b32.xlu0 %v2004_v56, %s1359_s26 }
 0x359   :  { %1076 = vrot.lane.b32.xlu1 %v1991_v39, %s1360_s0 }
 0x35b   :  { %1078 = vrot.lane.b32.xlu0 %v1996_v45, %s1360_s0 }
 0x35d   :  { %1080 = vrot.lane.b32.xlu1 %v2000_v1, %s1360_s0 }
 0x35f   :  { %1082 = vrot.lane.b32.xlu0 %v2004_v56, %s1360_s0 }
 0x361   :  { %1044 = vrot.lane.b32.xlu1 %v1991_v39, %s1361_s27 }
 0x363   :  { %1046 = vrot.lane.b32.xlu0 %v1996_v45, %s1361_s27 }
 0x365   :  { %1048 = vrot.lane.b32.xlu1 %v2000_v1, %s1361_s27 }
 0x367   :  { %1050 = vrot.lane.b32.xlu0 %v2004_v56, %s1361_s27 }
 0x369   :  { %1012 = vrot.lane.b32.xlu1 %v1991_v39, %s1362_s28 }
 0x36b   :  { %1014 = vrot.lane.b32.xlu0 %v1996_v45, %s1362_s28 }
 0x36d   :  { %1016 = vrot.lane.b32.xlu1 %v2000_v1, %s1362_s28 }
 0x36f   :  { %1018 = vrot.lane.b32.xlu0 %v2004_v56, %s1362_s28 }
 0x371   :  { %1028 = vrot.lane.b32.xlu1 %v1991_v39, %s1363_s29 }
 0x373   :  { %1030 = vrot.lane.b32.xlu0 %v1996_v45, %s1363_s29 }
 0x375   :  { %1032 = vrot.lane.b32.xlu1 %v2000_v1, %s1363_s29 }
 0x377   :  { %1034 = vrot.lane.b32.xlu0 %v2004_v56, %s1363_s29 }
 0x379   :  { %980 = vrot.lane.b32.xlu1 %v1991_v39, %s1364_s30 }
 0x37b   :  { %982 = vrot.lane.b32.xlu0 %v1996_v45, %s1364_s30 }
 0x37d   :  { %984 = vrot.lane.b32.xlu1 %v2000_v1, %s1364_s30 }
 0x37f   :  { %986 = vrot.lane.b32.xlu0 %v2004_v56, %s1364_s30 }
 0x381   :  { %996 = vrot.lane.b32.xlu1 %v1991_v39, %s1366_s12 }
 0x383   :  { %998 = vrot.lane.b32.xlu0 %v1996_v45, %s1366_s12 }
 0x385   :  { %1000 = vrot.lane.b32.xlu1 %v2000_v1, %s1366_s12 }
 0x387   :  { %1002 = vrot.lane.b32.xlu0 %v2004_v56, %s1366_s12 }
 0x389   :  { %1131 = vperm.xlu1 %1352, %v1128_v2  }
 0x3bb   :  { %v1093_v7 = vpop.permute.xlu1 %1092 }
 0x3bd   :  { %v1095_v57 = vpop.permute.xlu0 %1094 }
 0x3be   :  { %v1102_v0 = vsel %vm333_vm0, %v1093_v7, %v1095_v57 }
 0x3bf   :  { %v1104_v58 = vmul.f32 %v1102_v0, %v1545_v17  ;;  %v1097_v59 = vpop.permute.xlu1 %1096 }
 0x3c0   :  { %v1101_v62 = vsel %vm333_vm0, %v1095_v57, %v1097_v59 }
 0x3c1   :  { %v1124_v15 = vpack.c.bf16 %v1104_v58, %v1104_v58  ;;  %v1105_v25 = vmul.f32 %v1101_v62, %v1548_v18  ;;  %v1099_v28 = vpop.permute.xlu0 %1098 }
 0x3c2   :  { %v1100_v30 = vsel %vm333_vm0, %v1097_v59, %v1099_v28  ;;  %v1103_v11 = vsel %vm333_vm0, %v1099_v28, %v1093_v7 }
 0x3c3   :  { %v1125_v35 = vpack.c.bf16 %v1105_v25, %v1105_v25  ;;  %v1106_v36 = vmul.f32 %v1100_v30, %v1542_v16  ;;  %v1107_v4 = vmul.f32 %v1103_v11, %v1551_v19  ;;  %v1061_v17 = vpop.permute.xlu1 %1060  ;;  %v1138_v18 = vsel %vm395_vm1, %v1124_v15, 0 }
 0x3c5   :  { %v1126_v12 = vpack.c.bf16 %v1106_v36, %v1106_v36  ;;  %v1127_v3 = vpack.c.bf16 %v1107_v4, %v1107_v4  ;;  %1258 = vmatprep.subr.msk.bf16.mxu1 %vm395_vm1, %v1125_v35  ;;  %v1063_v48 = vpop.permute.xlu0 %1062 }
 0x3c6   :  { %1156 = vmatpush1.bf16.msra.mxu1 %v1138_v18  ;;  %v1070_v44 = vsel %vm253_vm3, %v1061_v17, %v1063_v48 }
 0x3c7   :  { %v1065_v37 = vpop.permute.xlu1 %1064  ;;  %1260 = vmatprep.subr.msk.bf16.mxu0 %vm395_vm1, %v1127_v3  ;;  %v1144_v50 = vsel %vm395_vm1, %v1126_v12, 0  ;;  %v1072_v59 = vmul.f32 %v1070_v44, %v1605_v54 }
 0x3c8   :  { %1197 = vmatpush1.bf16.msra.mxu0 %v1144_v50  ;;  %v1069_v19 = vsel %vm253_vm3, %v1063_v48, %v1065_v37 }
 0x3c9   :  { %v1067_v40 = vpop.permute.xlu0 %1066  ;;  %v1073_v57 = vmul.f32 %v1069_v19, %v1581_v43 }
 0x3ca   :  { %v1068_v9 = vsel %vm253_vm3, %v1065_v37, %v1067_v40  ;;  %v1071_v55 = vsel %vm253_vm3, %v1067_v40, %v1061_v17 }
 0x3cb   :  { %v1077_v10 = vpop.permute.xlu1 %1076  ;;  %v1074_v62 = vmul.f32 %v1068_v9, %v1586_v47 }
 0x3cd   :  { %v1079_v16 = vpop.permute.xlu0 %1078 }
 0x3ce   :  { %v1086_v41 = vsel %vm293_vm2, %v1077_v10, %v1079_v16 }
 0x3cf   :  { %v1081_v46 = vpop.permute.xlu1 %1080  ;;  %v1088_v2 = vmul.f32 %v1086_v41, %v1591_v49  ;;  %v1075_v49 = vmul.f32 %v1071_v55, %v1578_v42 }
 0x3d0   :  { %v1085_v7 = vsel %vm293_vm2, %v1079_v16, %v1081_v46 }
 0x3d1   :  { %v1089_v0 = vmul.f32 %v1085_v7, %v1599_v52  ;;  %v1083_v58 = vpop.permute.xlu0 %1082  ;;  %v1120_v52 = vpack.c.bf16 %v1088_v2, %v1072_v59 }
 0x3d2   :  { %v1084_v15 = vsel %vm293_vm2, %v1081_v46, %v1083_v58  ;;  %v1087_v25 = vsel %vm293_vm2, %v1083_v58, %v1077_v10 }
 0x3d3   :  { %v1090_v28 = vmul.f32 %v1084_v15, %v1602_v53  ;;  %v1091_v30 = vmul.f32 %v1087_v25, %v1596_v51  ;;  %v1045_v43 = vpop.permute.xlu1 %1044  ;;  %v1121_v11 = vpack.c.bf16 %v1089_v0, %v1073_v57 }
 0x3d5   :  { %v1122_v35 = vpack.c.bf16 %v1090_v28, %v1074_v62  ;;  %1157 = vmatprep.subr.bf16.mxu1 %v1121_v11  ;;  %v1047_v54 = vpop.permute.xlu0 %1046  ;;  %v1123_v36 = vpack.c.bf16 %v1091_v30, %v1075_v49 }
 0x3d6   :  { %v1054_v47 = vsel %vm213_vm4, %v1045_v43, %v1047_v54  ;;  %1158 = vmatpush1.bf16.msra.mxu1 %v1120_v52 }
 0x3d7   :  { %v1049_v4 = vpop.permute.xlu1 %1048  ;;  %1198 = vmatprep.subr.bf16.mxu0 %v1123_v36  ;;  %v1056_v17 = vmul.f32 %v1054_v47, %v1630_v27 }
 0x3d8   :  { %v1053_v42 = vsel %vm213_vm4, %v1047_v54, %v1049_v4  ;;  %1199 = vmatpush1.bf16.msra.mxu0 %v1122_v35 }
 0x3d9   :  { %v1057_v51 = vmul.f32 %v1053_v42, %v1638_v31  ;;  %v1051_v53 = vpop.permute.xlu0 %1050  ;;  %v1116_v50 = vpack.c.bf16 %v1056_v17, %v1991_v39 }
 0x3da   :  { %v1052_v12 = vsel %vm213_vm4, %v1049_v4, %v1051_v53  ;;  %v1055_v3 = vsel %vm213_vm4, %v1051_v53, %v1045_v43 }
 0x3db   :  { %v1058_v48 = vmul.f32 %v1052_v12, %v1641_v32  ;;  %v1059_v18 = vmul.f32 %v1055_v3, %v1633_v29  ;;  %v1013_v37 = vpop.permute.xlu1 %1012  ;;  %v1117_v27 = vpack.c.bf16 %v1057_v51, %v1996_v45 }
 0x3dd   :  { %v1118_v40 = vpack.c.bf16 %v1058_v48, %v2000_v1  ;;  %1159 = vmatprep.subr.bf16.mxu1 %v1117_v27  ;;  %v1015_v31 = vpop.permute.xlu0 %1014  ;;  %v1119_v10 = vpack.c.bf16 %v1059_v18, %v2004_v56 }
 0x3de   :  { %1160 = vmatpush1.bf16.msra.mxu1 %v1116_v50  ;;  %v1022_v29 = vsel %vm133_vm5, %v1013_v37, %v1015_v31 }
 0x3df   :  { %v1017_v16 = vpop.permute.xlu1 %1016  ;;  %1200 = vmatprep.subr.bf16.mxu0 %v1119_v10  ;;  %v1025_v39 = vmul.f32 %v1022_v29, %v1665_v60 }
 0x3e0   :  { %1201 = vmatpush1.bf16.msra.mxu0 %v1118_v40  ;;  %v1021_v55 = vsel %vm133_vm5, %v1015_v31, %v1017_v16 }
 0x3e1   :  { %v1019_v19 = vpop.permute.xlu0 %1018  ;;  %v1026_v25 = vmul.f32 %v1021_v55, %v1677_v5 }
 0x3e2   :  { %v1020_v56 = vsel %vm133_vm5, %v1017_v16, %v1019_v19  ;;  %v1023_v9 = vsel %vm133_vm5, %v1019_v19, %v1013_v37 }
 0x3e3   :  { %v1029_v41 = vpop.permute.xlu1 %1028  ;;  %v1024_v0 = vmul.f32 %v1023_v9, %v1674_v63  ;;  %v1027_v58 = vmul.f32 %v1020_v56, %v1680_v6 }
 0x3e5   :  { %v1031_v32 = vpop.permute.xlu0 %1030 }
 0x3e6   :  { %v1038_v45 = vsel %vm173_vm6, %v1029_v41, %v1031_v32 }
 0x3e7   :  { %v1041_v1 = vmul.f32 %v1038_v45, %v1669_v61  ;;  %v1033_v44 = vpop.permute.xlu1 %1032 }
 0x3e8   :  { %v1037_v46 = vsel %vm173_vm6, %v1031_v32, %v1033_v44 }
 0x3e9   :  { %v1035_v2 = vpop.permute.xlu0 %1034  ;;  %v1113_v7 = vpack.c.bf16 %v1041_v1, %v1025_v39  ;;  %v1042_v57 = vmul.f32 %v1037_v46, %v1690_v22 }
 0x3ea   :  { %v1036_v60 = vsel %vm173_vm6, %v1033_v44, %v1035_v2  ;;  %v1039_v61 = vsel %vm173_vm6, %v1035_v2, %v1029_v41 }
 0x3eb   :  { %v1040_v59 = vmul.f32 %v1039_v61, %v1687_v21  ;;  %v1043_v62 = vmul.f32 %v1036_v60, %v1697_v26  ;;  %v981_v15 = vpop.permute.xlu1 %980  ;;  %1161 = vmatprep.subr.bf16.mxu1 %v1113_v7  ;;  %v1114_v30 = vpack.c.bf16 %v1042_v57, %v1026_v25 }
 0x3ed   :  { %v1112_v49 = vpack.c.bf16 %v1040_v59, %v1024_v0  ;;  %v983_v22 = vpop.permute.xlu0 %982  ;;  %v1115_v28 = vpack.c.bf16 %v1043_v62, %v1027_v58 }
 0x3ee   :  { %v990_v6 = vsel %vm54_vm7, %v981_v15, %v983_v22 }
 0x3ef   :  { %v985_v43 = vpop.permute.xlu1 %984  ;;  %1162 = vmatpush1.bf16.msra.mxu1 %v1112_v49  ;;  %1202 = vmatprep.subr.bf16.mxu0 %v1115_v28  ;;  %v993_v52 = vmul.f32 %v990_v6, %v1721_v13 }
 0x3f0   :  { %1203 = vmatpush1.bf16.msra.mxu0 %v1114_v30  ;;  %v989_v4 = vsel %vm54_vm7, %v983_v22, %v985_v43 }
 0x3f1   :  { %v987_v11 = vpop.permute.xlu0 %986  ;;  %v994_v18 = vmul.f32 %v989_v4, %v1733_v23 }
 0x3f2   :  { %v988_v54 = vsel %vm54_vm7, %v985_v43, %v987_v11  ;;  %v991_v36 = vsel %vm54_vm7, %v987_v11, %v981_v15 }
 0x3f3   :  { %v997_v63 = vpop.permute.xlu1 %996  ;;  %v992_v53 = vmul.f32 %v991_v36, %v1730_v20  ;;  %v995_v12 = vmul.f32 %v988_v54, %v1736_v24 }
 0x3f5   :  { %v999_v21 = vpop.permute.xlu0 %998 }
 0x3f6   :  { %v1006_v26 = vsel %vm93_vm8, %v997_v63, %v999_v21 }
 0x3f7   :  { %v1009_v5 = vmul.f32 %v1006_v26, %v1725_v14  ;;  %v1001_v35 = vpop.permute.xlu1 %1000 }
 0x3f8   :  { %v1005_v47 = vsel %vm93_vm8, %v999_v21, %v1001_v35 }
 0x3f9   :  { %v1003_v17 = vpop.permute.xlu0 %1002  ;;  %v1109_v42 = vpack.c.bf16 %v1009_v5, %v993_v52  ;;  %v1010_v51 = vmul.f32 %v1005_v47, %v1746_v34 }
 0x3fa   :  { %v1004_v13 = vsel %vm93_vm8, %v1001_v35, %v1003_v17  ;;  %v1007_v14 = vsel %vm93_vm8, %v1003_v17, %v997_v63 }
 0x3fb   :  { %v1008_v3 = vmul.f32 %v1007_v14, %v1743_v33  ;;  %v1011_v48 = vmul.f32 %v1004_v13, %v1753_v38  ;;  %1163 = vmatprep.subr.bf16.mxu1 %v1109_v42  ;;  %v1110_v34 = vpack.c.bf16 %v1010_v51, %v994_v18 }
 0x3fd   :  { %v1108_v37 = vpack.c.bf16 %v1008_v3, %v992_v53  ;;  %v1111_v27 = vpack.c.bf16 %v1011_v48, %v995_v12 }
 0x3ff   :  { %1164 = vmatpush1.bf16.msra.mxu1 %v1108_v37  ;;  %1204 = vmatprep.subr.bf16.mxu0 %v1111_v27 }
 0x400   :  { %1205 = vmatpush1.bf16.msra.mxu0 %v1110_v34 }
 0x402   :  { %1259 = vmatmul.mubr.msk.bf16.vlgmr.msra.gmra.mxu1 %vm391_vm9, %v979_v8 }
 0x403   :  { %1261 = vmatmul.mubr.msk.bf16.vlgmr.msra.gmra.mxu0 %vm391_vm9, %v979_v8 }
 0x404   :  { %v1132_v20 = vpop.permute.xlu1 %1131 }
 0x4c2   :  { %v1183_v24 = vpop.f32.mrf.mxu1 }
 0x4c3   :  { %v1184_v33 = vadd.f32 %v1183_v24, %v1132_v20  ;;  %v1224_v38 = vpop.f32.mrf.mxu0 }
 0x4c4   :  { %v1225_v50 = vadd.f32 %v1224_v38, %v1132_v20  ;;  %v1185_v23 = vpop.f32.mrf.mxu1 }
 0x4c5   :  { %1231 = vst [vmem:[%s2201_s11] sm:$0xff] %v1184_v33  ;;  %v1186_v40 = vadd.f32 %v1185_v23, %v1132_v20  ;;  %v1226_v31 = vpop.f32.mrf.mxu0 }
 0x4c6   :  { %1233 = vst [vmem:[%s2201_s11 + $0x10] sm:$0xff] %v1225_v50  ;;  %v1227_v10 = vadd.f32 %v1226_v31, %v1132_v20  ;;  %v1187_v16 = vpop.f32.mrf.mxu1 }
 0x4c7   :  { %1232 = vst [vmem:[%s2201_s11 + $0x8] sm:$0xff] %v1186_v40  ;;  %v1228_v19 = vpop.f32.mrf.mxu0 }
 0x4c8   :  { %1234 = vst [vmem:[%s2201_s11 + $0x18] sm:$0xff] %v1227_v10  ;;  %v1188_v41 = vpop.f32.mrf.mxu1 }
 0x4c9   :  { %v1229_v29 = vpop.f32.mrf.mxu0 }

</bundles_post_ra>
